<compile_context>
chip_gen: v5e
topology: v5e:2x2
jax: 0.10.0
libtpu: 0.0.40
codegen_flags: <defaults>
</compile_context>

<pallas_src>
import functools

import jax
import jax.numpy as jnp
import numpy as np
from jax import lax
from jax.experimental import pallas as pl
from jax.experimental.pallas import tpu as pltpu

EPS = 1e-5     # nn.InstanceNorm3d default eps (affine=False, no running stats)
SLOPE = 0.01   # nn.LeakyReLU default negative_slope


def _leaky(a):
    return jnp.where(a > 0, a, SLOPE * a)


def _inorm(a, inv_s):
    # a: (C, S) f32; single-pass instance norm per channel (row) over lanes.
    mu = jnp.sum(a, axis=1, keepdims=True) * inv_s
    ex2 = jnp.sum(a * a, axis=1, keepdims=True) * inv_s
    var = jnp.maximum(ex2 - mu * mu, 0.0)
    return (a - mu) * lax.rsqrt(var + EPS)


def basic_block_kernel(x_ref, mask_ref, w1_ref, b1_ref, w2_ref, b2_ref,
                       wd_ref, bd_ref, out_ref, col_ref, *, D, H, W):
    # x_ref:    (1, Cin, S)       flattened input sample (f32 or bf16)
    # mask_ref: (27, S)           combined boundary masks per tap, f32 0/1
    # w1_ref:   (Cout, 27*Cin)    conv1 weights, tap-major, bf16
    # b1_ref:   (Cout, 1)         conv1 bias, f32
    # w2_ref:   (Cout, 27*Cout)   conv2 weights, tap-major, bf16
    # b2_ref:   (Cout, 1)         conv2 bias, f32
    # wd_ref:   (Cout, Cin)       1x1x1 downsample weights, bf16
    # bd_ref:   (Cout, 1)         downsample bias, f32
    # out_ref:  (1, Cout, S)      pre-upsample output, f32
    # col_ref:  (27*Cmax, S)      bf16 im2col scratch (reused by both convs)
    Cin = x_ref.shape[1]
    Cout = out_ref.shape[1]
    S = D * H * W
    HW = H * W
    inv_s = 1.0 / S

    def build_cols(val, c):
        # val: (c, S) f32.  Pack 27 lane-rotated, boundary-masked copies of
        # val into col_ref[0:27*c, :] (tap-major im2col).  pltpu.roll wraps
        # circularly; mask_ref zeroes exactly the wrapped / padded positions,
        # so the result equals a zero-padded 3x3x3 neighbourhood gather.
        k = 0
        for kd in range(3):
            for kh in range(3):
                for kw in range(3):
                    off = (kd - 1) * HW + (kh - 1) * W + (kw - 1)
                    if off == 0:
                        tap = val                              # centre tap: mask all-ones
                    else:
                        shifted = pltpu.roll(val, shift=(-off) % S, axis=1)
                        tap = shifted * mask_ref[k:k + 1, :]
                    col_ref[k * c:(k + 1) * c, :] = tap.astype(jnp.bfloat16)
                    k += 1

    xr = x_ref[0]                                              # (Cin, S)
    xf = xr.astype(jnp.float32)                                # roll/mask path
    xb = xr.astype(jnp.bfloat16)                               # MXU operand

    # 1x1x1 downsample -> IN  (its own tiny MXU dot; no zero-padded stacking).
    res = jnp.dot(wd_ref[...], xb,
                  preferred_element_type=jnp.float32) + bd_ref[...]
    res = _inorm(res, inv_s)                                   # (Cout, S)

    # conv1 (3x3x3) -> IN -> LeakyReLU : one im2col matmul.
    build_cols(xf, Cin)
    h1 = jnp.dot(w1_ref[...], col_ref[0:27 * Cin, :],
                 preferred_element_type=jnp.float32) + b1_ref[...]
    h1 = _leaky(_inorm(h1, inv_s))                             # (Cout, S) f32

    # conv2 (3x3x3) -> IN : one im2col matmul.
    build_cols(h1, Cout)
    h2 = jnp.dot(w2_ref[...], col_ref[0:27 * Cout, :],
                 preferred_element_type=jnp.float32) + b2_ref[...]
    h2 = _inorm(h2, inv_s)

    out_ref[0] = _leaky(h2 + res)


def basic_block_pallas(x, params):
    """x: (N, Cin, D, H, W) float32 or bfloat16 (PyTorch NCDHW layout)."""
    w1, b1, w2, b2, wd, bd = params
    N, Cin, D, H, W = x.shape
    Cout = w1.shape[0]
    S = D * H * W
    HW = H * W
    Cmax = max(Cin, Cout)

    # --- tap-major bf16 weight matrices + f32 biases ------------------------
    w1m = jnp.transpose(w1, (0, 2, 3, 4, 1)).reshape(Cout, 27 * Cin).astype(jnp.bfloat16)
    w2m = jnp.transpose(w2, (0, 2, 3, 4, 1)).reshape(Cout, 27 * Cout).astype(jnp.bfloat16)
    wdm = wd.reshape(Cout, Cin).astype(jnp.bfloat16)
    b1c = b1.reshape(Cout, 1)
    b2c = b2.reshape(Cout, 1)
    bdc = bd.reshape(Cout, 1)

    # --- 27 combined boundary masks for the flattened tap shifts ------------
    # (compile-time numpy constants; one row per tap in the same kd,kh,kw order
    #  as build_cols).  They zero both the zero-padding positions AND the
    #  positions where a circular roll would wrap — the two sets coincide.
    lin = np.arange(S, dtype=np.int64)
    d_i, h_i, w_i = lin // HW, (lin // W) % H, lin % W
    masks = np.empty((27, S), np.float32)
    k = 0
    for kd in (-1, 0, 1):
        for kh in (-1, 0, 1):
            for kw in (-1, 0, 1):
                ok = ((d_i + kd >= 0) & (d_i + kd <= D - 1) &
                      (h_i + kh >= 0) & (h_i + kh <= H - 1) &
                      (w_i + kw >= 0) & (w_i + kw <= W - 1))
                masks[k] = ok.astype(np.float32)
                k += 1
    masks = jnp.asarray(masks)

    # Input crosses HBM in its natural flattened NC(S) layout (metadata-only
    # reshape).  If the producer already emits bf16 the kernel uses it as-is
    # (halved input DMA); we deliberately do NOT add a wrapper-side cast,
    # which would be an extra HBM pass.
    x_flat = x.reshape(N, Cin, S)

    # Scoped-VMEM limit sized to the per-step footprint, capped at 64 MiB so
    # it is also valid on v7x (64 MiB physical per TensorCore).
    col_bytes = 27 * Cmax * S * 2
    io_bytes = 2 * (Cin * S * x_flat.dtype.itemsize + Cout * S * 4)
    tmp_bytes = 8 * Cout * S * 4
    vmem_limit = int(min(64 * 1024 * 1024,
                         max(32 * 1024 * 1024,
                             2 * (col_bytes + io_bytes + tmp_bytes))))

    out_flat = pl.pallas_call(
        functools.partial(basic_block_kernel, D=D, H=H, W=W),
        out_shape=jax.ShapeDtypeStruct((N, Cout, S), jnp.float32),
        grid_spec=pltpu.PrefetchScalarGridSpec(
            num_scalar_prefetch=0,
            grid=(N,),
            in_specs=[
                pl.BlockSpec((1, Cin, S), lambda n: (n, 0, 0)),
                # block-invariant operands: single-buffered
                pl.BlockSpec((27, S), lambda n: (0, 0),
                             pipeline_mode=pl.Buffered(1)),
                pl.BlockSpec((Cout, 27 * Cin), lambda n: (0, 0),
                             pipeline_mode=pl.Buffered(1)),
                pl.BlockSpec((Cout, 1), lambda n: (0, 0),
                             pipeline_mode=pl.Buffered(1)),
                pl.BlockSpec((Cout, 27 * Cout), lambda n: (0, 0),
                             pipeline_mode=pl.Buffered(1)),
                pl.BlockSpec((Cout, 1), lambda n: (0, 0),
                             pipeline_mode=pl.Buffered(1)),
                pl.BlockSpec((Cout, Cin), lambda n: (0, 0),
                             pipeline_mode=pl.Buffered(1)),
                pl.BlockSpec((Cout, 1), lambda n: (0, 0),
                             pipeline_mode=pl.Buffered(1)),
            ],
            out_specs=pl.BlockSpec((1, Cout, S), lambda n: (n, 0, 0)),
            scratch_shapes=[pltpu.VMEM((27 * Cmax, S), jnp.bfloat16)],
        ),
        compiler_params=pltpu.CompilerParams(
            dimension_semantics=("parallel",),
            vmem_limit_bytes=vmem_limit),
        # TODO(synk): for realistic micro_sam volumes, tile the grid over D
        # (1-voxel halo) with S_tile derived from
        # pltpu.get_tpu_info().vmem_capacity_bytes (v7x: 64 MiB) — this needs
        # a two-pass InstanceNorm (accumulate per-channel sum/sumsq across
        # tiles on an 'arbitrary' axis, then normalize) to stay correct, and
        # gives a second parallel axis for v7x's two TensorCores.
    )(x_flat, masks, w1m, b1c, w2m, b2c, wdm, bdc)

    # nn.Upsample(scale_factor=(1, 2, 2), mode='nearest') + shape restore.
    # TODO(synk): fuse this (1,2,2) nearest upsample into the kernel's output
    # stores (row-slab duplication via a second store + a lane interleave /
    # strided store for the W duplication) to remove this extra HBM pass; left
    # as a single fused XLA broadcast+reshape here.
    o5 = out_flat.reshape(N, Cout, D, H, W)
    up = jnp.broadcast_to(o5[:, :, :, :, None, :, None],
                          (N, Cout, D, H, 2, W, 2))
    return up.reshape(N, Cout, D, 2 * H, 2 * W)


def ref_forward(x, params):
    """Pure-JAX reference of the PyTorch BasicBlock forward.  Conv operands are
    rounded to bf16 so the reference matches the MXU's bf16 x bf16 -> f32
    arithmetic used inside the kernel."""
    w1, b1, w2, b2, wd, bd = params
    bf = jnp.bfloat16

    def conv(a, w, b, pad):
        y = lax.conv_general_dilated(
            a.astype(bf), w.astype(bf), window_strides=(1, 1, 1),
            padding=((pad, pad),) * 3,
            dimension_numbers=("NCDHW", "OIDHW", "NCDHW"),
            preferred_element_type=jnp.float32)
        return y + b[None, :, None, None, None]

    def inorm(a):
        mu = jnp.mean(a, axis=(2, 3, 4), keepdims=True)
        var = jnp.mean((a - mu) ** 2, axis=(2, 3, 4), keepdims=True)
        return (a - mu) * lax.rsqrt(var + EPS)

    res = inorm(conv(x, wd, bd, 0))
    h = _leaky(inorm(conv(x, w1, b1, 1)))
    h = inorm(conv(h, w2, b2, 1))
    out = _leaky(h + res)
    out = jnp.repeat(jnp.repeat(out, 2, axis=3), 2, axis=4)
    return out


if __name__ == "__main__":
    key = jax.random.PRNGKey(0)
    N, Cin, Cout, D, H, W = 2, 4, 8, 4, 8, 8
    ks = jax.random.split(key, 7)

    x = jax.random.normal(ks[0], (N, Cin, D, H, W), jnp.float32)     # NCDHW
    w1 = 0.1 * jax.random.normal(ks[1], (Cout, Cin, 3, 3, 3), jnp.float32)
    b1 = 0.1 * jax.random.normal(ks[2], (Cout,), jnp.float32)
    w2 = 0.1 * jax.random.normal(ks[3], (Cout, Cout, 3, 3, 3), jnp.float32)
    b2 = 0.1 * jax.random.normal(ks[4], (Cout,), jnp.float32)
    wd = 0.1 * jax.random.normal(ks[5], (Cout, Cin, 1, 1, 1), jnp.float32)
    bd = 0.1 * jax.random.normal(ks[6], (Cout,), jnp.float32)
    params = (w1, b1, w2, b2, wd, bd)

    fwd = jax.jit(basic_block_pallas)
    out = jax.block_until_ready(fwd(x, params))
    assert out.shape == (N, Cout, D, 2 * H, 2 * W), out.shape

    ref = ref_forward(x, params)
    np.testing.assert_allclose(np.asarray(out), np.asarray(ref),
                               rtol=2e-3, atol=2e-3)
    print("KERNEL_OK")
</pallas_src>

<mosaic_0001>
module attributes {stable_mosaic.version = 11 : i64} {
  func.func @basic_block_kernel(%arg0: i32, %arg1: memref<1x4x256xf32, #tpu.memory_space<vmem>>, %arg2: memref<27x256xf32, #tpu.memory_space<vmem>>, %arg3: memref<8x108xbf16, #tpu.memory_space<vmem>>, %arg4: memref<8x1xf32, #tpu.memory_space<vmem>>, %arg5: memref<8x216xbf16, #tpu.memory_space<vmem>>, %arg6: memref<8x1xf32, #tpu.memory_space<vmem>>, %arg7: memref<8x4xbf16, #tpu.memory_space<vmem>>, %arg8: memref<8x1xf32, #tpu.memory_space<vmem>>, %arg9: memref<1x8x256xf32, #tpu.memory_space<vmem>>, %arg10: memref<216x256xbf16, #tpu.memory_space<vmem>>) attributes {dimension_semantics = [#tpu.dimension_semantics<parallel>], iteration_bounds = array<i64: 2>, scalar_prefetch = 0 : i64, scratch_operands = 1 : i64, tpu.core_type = #tpu.core_type<tc>, window_params = [{transform_indices = @transform_0, window_bounds = array<i64: 1, 4, 256>}, {pipeline_mode = #tpu.pipeline_mode<synchronous>, transform_indices = @transform_1, window_bounds = array<i64: 27, 256>}, {pipeline_mode = #tpu.pipeline_mode<synchronous>, transform_indices = @transform_2, window_bounds = array<i64: 8, 108>}, {pipeline_mode = #tpu.pipeline_mode<synchronous>, transform_indices = @transform_3, window_bounds = array<i64: 8, 1>}, {pipeline_mode = #tpu.pipeline_mode<synchronous>, transform_indices = @transform_4, window_bounds = array<i64: 8, 216>}, {pipeline_mode = #tpu.pipeline_mode<synchronous>, transform_indices = @transform_5, window_bounds = array<i64: 8, 1>}, {pipeline_mode = #tpu.pipeline_mode<synchronous>, transform_indices = @transform_6, window_bounds = array<i64: 8, 4>}, {pipeline_mode = #tpu.pipeline_mode<synchronous>, transform_indices = @transform_7, window_bounds = array<i64: 8, 1>}, {transform_indices = @transform_8, window_bounds = array<i64: 1, 8, 256>}]} {
    %c0 = arith.constant 0 : index
    %c0_0 = arith.constant 0 : index
    %c0_1 = arith.constant 0 : index
    %0 = vector.load %arg1[%c0, %c0_0, %c0_1] : memref<1x4x256xf32, #tpu.memory_space<vmem>>, vector<1x4x256xf32>
    %1 = vector.shape_cast %0 : vector<1x4x256xf32> to vector<4x256xf32>
    %2 = arith.truncf %1 : vector<4x256xf32> to vector<4x256xbf16>
    %c0_2 = arith.constant 0 : index
    %c0_3 = arith.constant 0 : index
    %3 = vector.load %arg7[%c0_2, %c0_3] : memref<8x4xbf16, #tpu.memory_space<vmem>>, vector<8x4xbf16>
    %cst = arith.constant dense<0.000000e+00> : vector<8x256xf32>
    %4 = tpu.matmul %3, %2, %cst {dimension_numbers = #tpu.dot_dimension_numbers<[1], [0], [0], [1], [0, 0, 1, 1], [], []>} : vector<8x4xbf16>, vector<4x256xbf16>, vector<8x256xf32> -> vector<8x256xf32>
    %c0_4 = arith.constant 0 : index
    %c0_5 = arith.constant 0 : index
    %5 = vector.load %arg8[%c0_4, %c0_5] : memref<8x1xf32, #tpu.memory_space<vmem>>, vector<8x1xf32>
    %6 = vector.broadcast %5 : vector<8x1xf32> to vector<8x256xf32>
    %7 = arith.addf %4, %6 : vector<8x256xf32>
    %cst_6 = arith.constant dense<0.000000e+00> : vector<8xf32>
    %8 = vector.multi_reduction <add>, %7, %cst_6 [1] : vector<8x256xf32> to vector<8xf32>
    %9 = vector.shape_cast %8 : vector<8xf32> to vector<8x1xf32>
    %cst_7 = arith.constant 3.906250e-03 : f32
    %10 = vector.broadcast %cst_7 : f32 to vector<8x1xf32>
    %11 = arith.mulf %9, %10 : vector<8x1xf32>
    %12 = arith.mulf %7, %7 : vector<8x256xf32>
    %cst_8 = arith.constant dense<0.000000e+00> : vector<8xf32>
    %13 = vector.multi_reduction <add>, %12, %cst_8 [1] : vector<8x256xf32> to vector<8xf32>
    %14 = vector.shape_cast %13 : vector<8xf32> to vector<8x1xf32>
    %cst_9 = arith.constant 3.906250e-03 : f32
    %15 = vector.broadcast %cst_9 : f32 to vector<8x1xf32>
    %16 = arith.mulf %14, %15 : vector<8x1xf32>
    %17 = arith.mulf %11, %11 : vector<8x1xf32>
    %18 = arith.subf %16, %17 : vector<8x1xf32>
    %cst_10 = arith.constant 0.000000e+00 : f32
    %19 = vector.broadcast %cst_10 : f32 to vector<8x1xf32>
    %20 = arith.maximumf %18, %19 : vector<8x1xf32>
    %21 = vector.broadcast %11 : vector<8x1xf32> to vector<8x256xf32>
    %22 = arith.subf %7, %21 : vector<8x256xf32>
    %cst_11 = arith.constant 9.99999974E-6 : f32
    %23 = vector.broadcast %cst_11 : f32 to vector<8x1xf32>
    %24 = arith.addf %20, %23 : vector<8x1xf32>
    %25 = math.rsqrt %24 : vector<8x1xf32>
    %26 = vector.broadcast %25 : vector<8x1xf32> to vector<8x256xf32>
    %27 = arith.mulf %22, %26 : vector<8x256xf32>
    %c73_i32 = arith.constant 73 : i32
    %28 = tpu.dynamic_rotate %1 by %c73_i32 dim 1 : vector<4x256xf32>, i32 -> vector<4x256xf32>
    %c0_12 = arith.constant 0 : index
    %c0_13 = arith.constant 0 : index
    %29 = vector.load %arg2[%c0_12, %c0_13] : memref<27x256xf32, #tpu.memory_space<vmem>>, vector<1x256xf32>
    %30 = vector.broadcast %29 : vector<1x256xf32> to vector<4x256xf32>
    %31 = arith.mulf %28, %30 : vector<4x256xf32>
    %32 = arith.truncf %31 : vector<4x256xf32> to vector<4x256xbf16>
    %c0_14 = arith.constant 0 : index
    %c0_15 = arith.constant 0 : index
    %33 = vector.load %arg10[%c0_14, %c0_15] : memref<216x256xbf16, #tpu.memory_space<vmem>>, vector<4x256xbf16>
    tpu.vector_store %arg10[%c0_14, %c0_15], %32 {strides = array<i32>} : memref<216x256xbf16, #tpu.memory_space<vmem>>, vector<4x256xbf16>,
    %c72_i32 = arith.constant 72 : i32
    %34 = tpu.dynamic_rotate %1 by %c72_i32 dim 1 : vector<4x256xf32>, i32 -> vector<4x256xf32>
    %c1 = arith.constant 1 : index
    %c0_16 = arith.constant 0 : index
    %35 = vector.load %arg2[%c1, %c0_16] : memref<27x256xf32, #tpu.memory_space<vmem>>, vector<1x256xf32>
    %36 = vector.broadcast %35 : vector<1x256xf32> to vector<4x256xf32>
    %37 = arith.mulf %34, %36 : vector<4x256xf32>
    %38 = arith.truncf %37 : vector<4x256xf32> to vector<4x256xbf16>
    %c4 = arith.constant 4 : index
    %c0_17 = arith.constant 0 : index
    %39 = vector.load %arg10[%c4, %c0_17] : memref<216x256xbf16, #tpu.memory_space<vmem>>, vector<4x256xbf16>
    tpu.vector_store %arg10[%c4, %c0_17], %38 {strides = array<i32>} : memref<216x256xbf16, #tpu.memory_space<vmem>>, vector<4x256xbf16>,
    %c71_i32 = arith.constant 71 : i32
    %40 = tpu.dynamic_rotate %1 by %c71_i32 dim 1 : vector<4x256xf32>, i32 -> vector<4x256xf32>
    %c2 = arith.constant 2 : index
    %c0_18 = arith.constant 0 : index
    %41 = vector.load %arg2[%c2, %c0_18] : memref<27x256xf32, #tpu.memory_space<vmem>>, vector<1x256xf32>
    %42 = vector.broadcast %41 : vector<1x256xf32> to vector<4x256xf32>
    %43 = arith.mulf %40, %42 : vector<4x256xf32>
    %44 = arith.truncf %43 : vector<4x256xf32> to vector<4x256xbf16>
    %c8 = arith.constant 8 : index
    %c0_19 = arith.constant 0 : index
    %45 = vector.load %arg10[%c8, %c0_19] : memref<216x256xbf16, #tpu.memory_space<vmem>>, vector<4x256xbf16>
    tpu.vector_store %arg10[%c8, %c0_19], %44 {strides = array<i32>} : memref<216x256xbf16, #tpu.memory_space<vmem>>, vector<4x256xbf16>,
    %c65_i32 = arith.constant 65 : i32
    %46 = tpu.dynamic_rotate %1 by %c65_i32 dim 1 : vector<4x256xf32>, i32 -> vector<4x256xf32>
    %c3 = arith.constant 3 : index
    %c0_20 = arith.constant 0 : index
    %47 = vector.load %arg2[%c3, %c0_20] : memref<27x256xf32, #tpu.memory_space<vmem>>, vector<1x256xf32>
    %48 = vector.broadcast %47 : vector<1x256xf32> to vector<4x256xf32>
    %49 = arith.mulf %46, %48 : vector<4x256xf32>
    %50 = arith.truncf %49 : vector<4x256xf32> to vector<4x256xbf16>
    %c12 = arith.constant 12 : index
    %c0_21 = arith.constant 0 : index
    %51 = vector.load %arg10[%c12, %c0_21] : memref<216x256xbf16, #tpu.memory_space<vmem>>, vector<4x256xbf16>
    tpu.vector_store %arg10[%c12, %c0_21], %50 {strides = array<i32>} : memref<216x256xbf16, #tpu.memory_space<vmem>>, vector<4x256xbf16>,
    %c64_i32 = arith.constant 64 : i32
    %52 = tpu.dynamic_rotate %1 by %c64_i32 dim 1 : vector<4x256xf32>, i32 -> vector<4x256xf32>
    %c4_22 = arith.constant 4 : index
    %c0_23 = arith.constant 0 : index
    %53 = vector.load %arg2[%c4_22, %c0_23] : memref<27x256xf32, #tpu.memory_space<vmem>>, vector<1x256xf32>
    %54 = vector.broadcast %53 : vector<1x256xf32> to vector<4x256xf32>
    %55 = arith.mulf %52, %54 : vector<4x256xf32>
    %56 = arith.truncf %55 : vector<4x256xf32> to vector<4x256xbf16>
    %c16 = arith.constant 16 : index
    %c0_24 = arith.constant 0 : index
    %57 = vector.load %arg10[%c16, %c0_24] : memref<216x256xbf16, #tpu.memory_space<vmem>>, vector<4x256xbf16>
    tpu.vector_store %arg10[%c16, %c0_24], %56 {strides = array<i32>} : memref<216x256xbf16, #tpu.memory_space<vmem>>, vector<4x256xbf16>,
    %c63_i32 = arith.constant 63 : i32
    %58 = tpu.dynamic_rotate %1 by %c63_i32 dim 1 : vector<4x256xf32>, i32 -> vector<4x256xf32>
    %c5 = arith.constant 5 : index
    %c0_25 = arith.constant 0 : index
    %59 = vector.load %arg2[%c5, %c0_25] : memref<27x256xf32, #tpu.memory_space<vmem>>, vector<1x256xf32>
    %60 = vector.broadcast %59 : vector<1x256xf32> to vector<4x256xf32>
    %61 = arith.mulf %58, %60 : vector<4x256xf32>
    %62 = arith.truncf %61 : vector<4x256xf32> to vector<4x256xbf16>
    %c20 = arith.constant 20 : index
    %c0_26 = arith.constant 0 : index
    %63 = vector.load %arg10[%c20, %c0_26] : memref<216x256xbf16, #tpu.memory_space<vmem>>, vector<4x256xbf16>
    tpu.vector_store %arg10[%c20, %c0_26], %62 {strides = array<i32>} : memref<216x256xbf16, #tpu.memory_space<vmem>>, vector<4x256xbf16>,
    %c57_i32 = arith.constant 57 : i32
    %64 = tpu.dynamic_rotate %1 by %c57_i32 dim 1 : vector<4x256xf32>, i32 -> vector<4x256xf32>
    %c6 = arith.constant 6 : index
    %c0_27 = arith.constant 0 : index
    %65 = vector.load %arg2[%c6, %c0_27] : memref<27x256xf32, #tpu.memory_space<vmem>>, vector<1x256xf32>
    %66 = vector.broadcast %65 : vector<1x256xf32> to vector<4x256xf32>
    %67 = arith.mulf %64, %66 : vector<4x256xf32>
    %68 = arith.truncf %67 : vector<4x256xf32> to vector<4x256xbf16>
    %c24 = arith.constant 24 : index
    %c0_28 = arith.constant 0 : index
    %69 = vector.load %arg10[%c24, %c0_28] : memref<216x256xbf16, #tpu.memory_space<vmem>>, vector<4x256xbf16>
    tpu.vector_store %arg10[%c24, %c0_28], %68 {strides = array<i32>} : memref<216x256xbf16, #tpu.memory_space<vmem>>, vector<4x256xbf16>,
    %c56_i32 = arith.constant 56 : i32
    %70 = tpu.dynamic_rotate %1 by %c56_i32 dim 1 : vector<4x256xf32>, i32 -> vector<4x256xf32>
    %c7 = arith.constant 7 : index
    %c0_29 = arith.constant 0 : index
    %71 = vector.load %arg2[%c7, %c0_29] : memref<27x256xf32, #tpu.memory_space<vmem>>, vector<1x256xf32>
    %72 = vector.broadcast %71 : vector<1x256xf32> to vector<4x256xf32>
    %73 = arith.mulf %70, %72 : vector<4x256xf32>
    %74 = arith.truncf %73 : vector<4x256xf32> to vector<4x256xbf16>
    %c28 = arith.constant 28 : index
    %c0_30 = arith.constant 0 : index
    %75 = vector.load %arg10[%c28, %c0_30] : memref<216x256xbf16, #tpu.memory_space<vmem>>, vector<4x256xbf16>
    tpu.vector_store %arg10[%c28, %c0_30], %74 {strides = array<i32>} : memref<216x256xbf16, #tpu.memory_space<vmem>>, vector<4x256xbf16>,
    %c55_i32 = arith.constant 55 : i32
    %76 = tpu.dynamic_rotate %1 by %c55_i32 dim 1 : vector<4x256xf32>, i32 -> vector<4x256xf32>
    %c8_31 = arith.constant 8 : index
    %c0_32 = arith.constant 0 : index
    %77 = vector.load %arg2[%c8_31, %c0_32] : memref<27x256xf32, #tpu.memory_space<vmem>>, vector<1x256xf32>
    %78 = vector.broadcast %77 : vector<1x256xf32> to vector<4x256xf32>
    %79 = arith.mulf %76, %78 : vector<4x256xf32>
    %80 = arith.truncf %79 : vector<4x256xf32> to vector<4x256xbf16>
    %c32 = arith.constant 32 : index
    %c0_33 = arith.constant 0 : index
    %81 = vector.load %arg10[%c32, %c0_33] : memref<216x256xbf16, #tpu.memory_space<vmem>>, vector<4x256xbf16>
    tpu.vector_store %arg10[%c32, %c0_33], %80 {strides = array<i32>} : memref<216x256xbf16, #tpu.memory_space<vmem>>, vector<4x256xbf16>,
    %c9_i32 = arith.constant 9 : i32
    %82 = tpu.dynamic_rotate %1 by %c9_i32 dim 1 : vector<4x256xf32>, i32 -> vector<4x256xf32>
    %c9 = arith.constant 9 : index
    %c0_34 = arith.constant 0 : index
    %83 = vector.load %arg2[%c9, %c0_34] : memref<27x256xf32, #tpu.memory_space<vmem>>, vector<1x256xf32>
    %84 = vector.broadcast %83 : vector<1x256xf32> to vector<4x256xf32>
    %85 = arith.mulf %82, %84 : vector<4x256xf32>
    %86 = arith.truncf %85 : vector<4x256xf32> to vector<4x256xbf16>
    %c36 = arith.constant 36 : index
    %c0_35 = arith.constant 0 : index
    %87 = vector.load %arg10[%c36, %c0_35] : memref<216x256xbf16, #tpu.memory_space<vmem>>, vector<4x256xbf16>
    tpu.vector_store %arg10[%c36, %c0_35], %86 {strides = array<i32>} : memref<216x256xbf16, #tpu.memory_space<vmem>>, vector<4x256xbf16>,
    %c8_i32 = arith.constant 8 : i32
    %88 = tpu.dynamic_rotate %1 by %c8_i32 dim 1 : vector<4x256xf32>, i32 -> vector<4x256xf32>
    %c10 = arith.constant 10 : index
    %c0_36 = arith.constant 0 : index
    %89 = vector.load %arg2[%c10, %c0_36] : memref<27x256xf32, #tpu.memory_space<vmem>>, vector<1x256xf32>
    %90 = vector.broadcast %89 : vector<1x256xf32> to vector<4x256xf32>
    %91 = arith.mulf %88, %90 : vector<4x256xf32>
    %92 = arith.truncf %91 : vector<4x256xf32> to vector<4x256xbf16>
    %c40 = arith.constant 40 : index
    %c0_37 = arith.constant 0 : index
    %93 = vector.load %arg10[%c40, %c0_37] : memref<216x256xbf16, #tpu.memory_space<vmem>>, vector<4x256xbf16>
    tpu.vector_store %arg10[%c40, %c0_37], %92 {strides = array<i32>} : memref<216x256xbf16, #tpu.memory_space<vmem>>, vector<4x256xbf16>,
    %c7_i32 = arith.constant 7 : i32
    %94 = tpu.dynamic_rotate %1 by %c7_i32 dim 1 : vector<4x256xf32>, i32 -> vector<4x256xf32>
    %c11 = arith.constant 11 : index
    %c0_38 = arith.constant 0 : index
    %95 = vector.load %arg2[%c11, %c0_38] : memref<27x256xf32, #tpu.memory_space<vmem>>, vector<1x256xf32>
    %96 = vector.broadcast %95 : vector<1x256xf32> to vector<4x256xf32>
    %97 = arith.mulf %94, %96 : vector<4x256xf32>
    %98 = arith.truncf %97 : vector<4x256xf32> to vector<4x256xbf16>
    %c44 = arith.constant 44 : index
    %c0_39 = arith.constant 0 : index
    %99 = vector.load %arg10[%c44, %c0_39] : memref<216x256xbf16, #tpu.memory_space<vmem>>, vector<4x256xbf16>
    tpu.vector_store %arg10[%c44, %c0_39], %98 {strides = array<i32>} : memref<216x256xbf16, #tpu.memory_space<vmem>>, vector<4x256xbf16>,
    %c1_i32 = arith.constant 1 : i32
    %100 = tpu.dynamic_rotate %1 by %c1_i32 dim 1 : vector<4x256xf32>, i32 -> vector<4x256xf32>
    %c12_40 = arith.constant 12 : index
    %c0_41 = arith.constant 0 : index
    %101 = vector.load %arg2[%c12_40, %c0_41] : memref<27x256xf32, #tpu.memory_space<vmem>>, vector<1x256xf32>
    %102 = vector.broadcast %101 : vector<1x256xf32> to vector<4x256xf32>
    %103 = arith.mulf %100, %102 : vector<4x256xf32>
    %104 = arith.truncf %103 : vector<4x256xf32> to vector<4x256xbf16>
    %c48 = arith.constant 48 : index
    %c0_42 = arith.constant 0 : index
    %105 = vector.load %arg10[%c48, %c0_42] : memref<216x256xbf16, #tpu.memory_space<vmem>>, vector<4x256xbf16>
    tpu.vector_store %arg10[%c48, %c0_42], %104 {strides = array<i32>} : memref<216x256xbf16, #tpu.memory_space<vmem>>, vector<4x256xbf16>,
    %106 = arith.truncf %1 : vector<4x256xf32> to vector<4x256xbf16>
    %c52 = arith.constant 52 : index
    %c0_43 = arith.constant 0 : index
    %107 = vector.load %arg10[%c52, %c0_43] : memref<216x256xbf16, #tpu.memory_space<vmem>>, vector<4x256xbf16>
    tpu.vector_store %arg10[%c52, %c0_43], %106 {strides = array<i32>} : memref<216x256xbf16, #tpu.memory_space<vmem>>, vector<4x256xbf16>,
    %c255_i32 = arith.constant 255 : i32
    %108 = tpu.dynamic_rotate %1 by %c255_i32 dim 1 : vector<4x256xf32>, i32 -> vector<4x256xf32>
    %c14 = arith.constant 14 : index
    %c0_44 = arith.constant 0 : index
    %109 = vector.load %arg2[%c14, %c0_44] : memref<27x256xf32, #tpu.memory_space<vmem>>, vector<1x256xf32>
    %110 = vector.broadcast %109 : vector<1x256xf32> to vector<4x256xf32>
    %111 = arith.mulf %108, %110 : vector<4x256xf32>
    %112 = arith.truncf %111 : vector<4x256xf32> to vector<4x256xbf16>
    %c56 = arith.constant 56 : index
    %c0_45 = arith.constant 0 : index
    %113 = vector.load %arg10[%c56, %c0_45] : memref<216x256xbf16, #tpu.memory_space<vmem>>, vector<4x256xbf16>
    tpu.vector_store %arg10[%c56, %c0_45], %112 {strides = array<i32>} : memref<216x256xbf16, #tpu.memory_space<vmem>>, vector<4x256xbf16>,
    %c249_i32 = arith.constant 249 : i32
    %114 = tpu.dynamic_rotate %1 by %c249_i32 dim 1 : vector<4x256xf32>, i32 -> vector<4x256xf32>
    %c15 = arith.constant 15 : index
    %c0_46 = arith.constant 0 : index
    %115 = vector.load %arg2[%c15, %c0_46] : memref<27x256xf32, #tpu.memory_space<vmem>>, vector<1x256xf32>
    %116 = vector.broadcast %115 : vector<1x256xf32> to vector<4x256xf32>
    %117 = arith.mulf %114, %116 : vector<4x256xf32>
    %118 = arith.truncf %117 : vector<4x256xf32> to vector<4x256xbf16>
    %c60 = arith.constant 60 : index
    %c0_47 = arith.constant 0 : index
    %119 = vector.load %arg10[%c60, %c0_47] : memref<216x256xbf16, #tpu.memory_space<vmem>>, vector<4x256xbf16>
    tpu.vector_store %arg10[%c60, %c0_47], %118 {strides = array<i32>} : memref<216x256xbf16, #tpu.memory_space<vmem>>, vector<4x256xbf16>,
    %c248_i32 = arith.constant 248 : i32
    %120 = tpu.dynamic_rotate %1 by %c248_i32 dim 1 : vector<4x256xf32>, i32 -> vector<4x256xf32>
    %c16_48 = arith.constant 16 : index
    %c0_49 = arith.constant 0 : index
    %121 = vector.load %arg2[%c16_48, %c0_49] : memref<27x256xf32, #tpu.memory_space<vmem>>, vector<1x256xf32>
    %122 = vector.broadcast %121 : vector<1x256xf32> to vector<4x256xf32>
    %123 = arith.mulf %120, %122 : vector<4x256xf32>
    %124 = arith.truncf %123 : vector<4x256xf32> to vector<4x256xbf16>
    %c64 = arith.constant 64 : index
    %c0_50 = arith.constant 0 : index
    %125 = vector.load %arg10[%c64, %c0_50] : memref<216x256xbf16, #tpu.memory_space<vmem>>, vector<4x256xbf16>
    tpu.vector_store %arg10[%c64, %c0_50], %124 {strides = array<i32>} : memref<216x256xbf16, #tpu.memory_space<vmem>>, vector<4x256xbf16>,
    %c247_i32 = arith.constant 247 : i32
    %126 = tpu.dynamic_rotate %1 by %c247_i32 dim 1 : vector<4x256xf32>, i32 -> vector<4x256xf32>
    %c17 = arith.constant 17 : index
    %c0_51 = arith.constant 0 : index
    %127 = vector.load %arg2[%c17, %c0_51] : memref<27x256xf32, #tpu.memory_space<vmem>>, vector<1x256xf32>
    %128 = vector.broadcast %127 : vector<1x256xf32> to vector<4x256xf32>
    %129 = arith.mulf %126, %128 : vector<4x256xf32>
    %130 = arith.truncf %129 : vector<4x256xf32> to vector<4x256xbf16>
    %c68 = arith.constant 68 : index
    %c0_52 = arith.constant 0 : index
    %131 = vector.load %arg10[%c68, %c0_52] : memref<216x256xbf16, #tpu.memory_space<vmem>>, vector<4x256xbf16>
    tpu.vector_store %arg10[%c68, %c0_52], %130 {strides = array<i32>} : memref<216x256xbf16, #tpu.memory_space<vmem>>, vector<4x256xbf16>,
    %c201_i32 = arith.constant 201 : i32
    %132 = tpu.dynamic_rotate %1 by %c201_i32 dim 1 : vector<4x256xf32>, i32 -> vector<4x256xf32>
    %c18 = arith.constant 18 : index
    %c0_53 = arith.constant 0 : index
    %133 = vector.load %arg2[%c18, %c0_53] : memref<27x256xf32, #tpu.memory_space<vmem>>, vector<1x256xf32>
    %134 = vector.broadcast %133 : vector<1x256xf32> to vector<4x256xf32>
    %135 = arith.mulf %132, %134 : vector<4x256xf32>
    %136 = arith.truncf %135 : vector<4x256xf32> to vector<4x256xbf16>
    %c72 = arith.constant 72 : index
    %c0_54 = arith.constant 0 : index
    %137 = vector.load %arg10[%c72, %c0_54] : memref<216x256xbf16, #tpu.memory_space<vmem>>, vector<4x256xbf16>
    tpu.vector_store %arg10[%c72, %c0_54], %136 {strides = array<i32>} : memref<216x256xbf16, #tpu.memory_space<vmem>>, vector<4x256xbf16>,
    %c200_i32 = arith.constant 200 : i32
    %138 = tpu.dynamic_rotate %1 by %c200_i32 dim 1 : vector<4x256xf32>, i32 -> vector<4x256xf32>
    %c19 = arith.constant 19 : index
    %c0_55 = arith.constant 0 : index
    %139 = vector.load %arg2[%c19, %c0_55] : memref<27x256xf32, #tpu.memory_space<vmem>>, vector<1x256xf32>
    %140 = vector.broadcast %139 : vector<1x256xf32> to vector<4x256xf32>
    %141 = arith.mulf %138, %140 : vector<4x256xf32>
    %142 = arith.truncf %141 : vector<4x256xf32> to vector<4x256xbf16>
    %c76 = arith.constant 76 : index
    %c0_56 = arith.constant 0 : index
    %143 = vector.load %arg10[%c76, %c0_56] : memref<216x256xbf16, #tpu.memory_space<vmem>>, vector<4x256xbf16>
    tpu.vector_store %arg10[%c76, %c0_56], %142 {strides = array<i32>} : memref<216x256xbf16, #tpu.memory_space<vmem>>, vector<4x256xbf16>,
    %c199_i32 = arith.constant 199 : i32
    %144 = tpu.dynamic_rotate %1 by %c199_i32 dim 1 : vector<4x256xf32>, i32 -> vector<4x256xf32>
    %c20_57 = arith.constant 20 : index
    %c0_58 = arith.constant 0 : index
    %145 = vector.load %arg2[%c20_57, %c0_58] : memref<27x256xf32, #tpu.memory_space<vmem>>, vector<1x256xf32>
    %146 = vector.broadcast %145 : vector<1x256xf32> to vector<4x256xf32>
    %147 = arith.mulf %144, %146 : vector<4x256xf32>
    %148 = arith.truncf %147 : vector<4x256xf32> to vector<4x256xbf16>
    %c80 = arith.constant 80 : index
    %c0_59 = arith.constant 0 : index
    %149 = vector.load %arg10[%c80, %c0_59] : memref<216x256xbf16, #tpu.memory_space<vmem>>, vector<4x256xbf16>
    tpu.vector_store %arg10[%c80, %c0_59], %148 {strides = array<i32>} : memref<216x256xbf16, #tpu.memory_space<vmem>>, vector<4x256xbf16>,
    %c193_i32 = arith.constant 193 : i32
    %150 = tpu.dynamic_rotate %1 by %c193_i32 dim 1 : vector<4x256xf32>, i32 -> vector<4x256xf32>
    %c21 = arith.constant 21 : index
    %c0_60 = arith.constant 0 : index
    %151 = vector.load %arg2[%c21, %c0_60] : memref<27x256xf32, #tpu.memory_space<vmem>>, vector<1x256xf32>
    %152 = vector.broadcast %151 : vector<1x256xf32> to vector<4x256xf32>
    %153 = arith.mulf %150, %152 : vector<4x256xf32>
    %154 = arith.truncf %153 : vector<4x256xf32> to vector<4x256xbf16>
    %c84 = arith.constant 84 : index
    %c0_61 = arith.constant 0 : index
    %155 = vector.load %arg10[%c84, %c0_61] : memref<216x256xbf16, #tpu.memory_space<vmem>>, vector<4x256xbf16>
    tpu.vector_store %arg10[%c84, %c0_61], %154 {strides = array<i32>} : memref<216x256xbf16, #tpu.memory_space<vmem>>, vector<4x256xbf16>,
    %c192_i32 = arith.constant 192 : i32
    %156 = tpu.dynamic_rotate %1 by %c192_i32 dim 1 : vector<4x256xf32>, i32 -> vector<4x256xf32>
    %c22 = arith.constant 22 : index
    %c0_62 = arith.constant 0 : index
    %157 = vector.load %arg2[%c22, %c0_62] : memref<27x256xf32, #tpu.memory_space<vmem>>, vector<1x256xf32>
    %158 = vector.broadcast %157 : vector<1x256xf32> to vector<4x256xf32>
    %159 = arith.mulf %156, %158 : vector<4x256xf32>
    %160 = arith.truncf %159 : vector<4x256xf32> to vector<4x256xbf16>
    %c88 = arith.constant 88 : index
    %c0_63 = arith.constant 0 : index
    %161 = vector.load %arg10[%c88, %c0_63] : memref<216x256xbf16, #tpu.memory_space<vmem>>, vector<4x256xbf16>
    tpu.vector_store %arg10[%c88, %c0_63], %160 {strides = array<i32>} : memref<216x256xbf16, #tpu.memory_space<vmem>>, vector<4x256xbf16>,
    %c191_i32 = arith.constant 191 : i32
    %162 = tpu.dynamic_rotate %1 by %c191_i32 dim 1 : vector<4x256xf32>, i32 -> vector<4x256xf32>
    %c23 = arith.constant 23 : index
    %c0_64 = arith.constant 0 : index
    %163 = vector.load %arg2[%c23, %c0_64] : memref<27x256xf32, #tpu.memory_space<vmem>>, vector<1x256xf32>
    %164 = vector.broadcast %163 : vector<1x256xf32> to vector<4x256xf32>
    %165 = arith.mulf %162, %164 : vector<4x256xf32>
    %166 = arith.truncf %165 : vector<4x256xf32> to vector<4x256xbf16>
    %c92 = arith.constant 92 : index
    %c0_65 = arith.constant 0 : index
    %167 = vector.load %arg10[%c92, %c0_65] : memref<216x256xbf16, #tpu.memory_space<vmem>>, vector<4x256xbf16>
    tpu.vector_store %arg10[%c92, %c0_65], %166 {strides = array<i32>} : memref<216x256xbf16, #tpu.memory_space<vmem>>, vector<4x256xbf16>,
    %c185_i32 = arith.constant 185 : i32
    %168 = tpu.dynamic_rotate %1 by %c185_i32 dim 1 : vector<4x256xf32>, i32 -> vector<4x256xf32>
    %c24_66 = arith.constant 24 : index
    %c0_67 = arith.constant 0 : index
    %169 = vector.load %arg2[%c24_66, %c0_67] : memref<27x256xf32, #tpu.memory_space<vmem>>, vector<1x256xf32>
    %170 = vector.broadcast %169 : vector<1x256xf32> to vector<4x256xf32>
    %171 = arith.mulf %168, %170 : vector<4x256xf32>
    %172 = arith.truncf %171 : vector<4x256xf32> to vector<4x256xbf16>
    %c96 = arith.constant 96 : index
    %c0_68 = arith.constant 0 : index
    %173 = vector.load %arg10[%c96, %c0_68] : memref<216x256xbf16, #tpu.memory_space<vmem>>, vector<4x256xbf16>
    tpu.vector_store %arg10[%c96, %c0_68], %172 {strides = array<i32>} : memref<216x256xbf16, #tpu.memory_space<vmem>>, vector<4x256xbf16>,
    %c184_i32 = arith.constant 184 : i32
    %174 = tpu.dynamic_rotate %1 by %c184_i32 dim 1 : vector<4x256xf32>, i32 -> vector<4x256xf32>
    %c25 = arith.constant 25 : index
    %c0_69 = arith.constant 0 : index
    %175 = vector.load %arg2[%c25, %c0_69] : memref<27x256xf32, #tpu.memory_space<vmem>>, vector<1x256xf32>
    %176 = vector.broadcast %175 : vector<1x256xf32> to vector<4x256xf32>
    %177 = arith.mulf %174, %176 : vector<4x256xf32>
    %178 = arith.truncf %177 : vector<4x256xf32> to vector<4x256xbf16>
    %c100 = arith.constant 100 : index
    %c0_70 = arith.constant 0 : index
    %179 = vector.load %arg10[%c100, %c0_70] : memref<216x256xbf16, #tpu.memory_space<vmem>>, vector<4x256xbf16>
    tpu.vector_store %arg10[%c100, %c0_70], %178 {strides = array<i32>} : memref<216x256xbf16, #tpu.memory_space<vmem>>, vector<4x256xbf16>,
    %c183_i32 = arith.constant 183 : i32
    %180 = tpu.dynamic_rotate %1 by %c183_i32 dim 1 : vector<4x256xf32>, i32 -> vector<4x256xf32>
    %c26 = arith.constant 26 : index
    %c0_71 = arith.constant 0 : index
    %181 = vector.load %arg2[%c26, %c0_71] : memref<27x256xf32, #tpu.memory_space<vmem>>, vector<1x256xf32>
    %182 = vector.broadcast %181 : vector<1x256xf32> to vector<4x256xf32>
    %183 = arith.mulf %180, %182 : vector<4x256xf32>
    %184 = arith.truncf %183 : vector<4x256xf32> to vector<4x256xbf16>
    %c104 = arith.constant 104 : index
    %c0_72 = arith.constant 0 : index
    %185 = vector.load %arg10[%c104, %c0_72] : memref<216x256xbf16, #tpu.memory_space<vmem>>, vector<4x256xbf16>
    tpu.vector_store %arg10[%c104, %c0_72], %184 {strides = array<i32>} : memref<216x256xbf16, #tpu.memory_space<vmem>>, vector<4x256xbf16>,
    %c0_73 = arith.constant 0 : index
    %c0_74 = arith.constant 0 : index
    %186 = vector.load %arg3[%c0_73, %c0_74] : memref<8x108xbf16, #tpu.memory_space<vmem>>, vector<8x108xbf16>
    %c0_75 = arith.constant 0 : index
    %c0_76 = arith.constant 0 : index
    %187 = vector.load %arg10[%c0_75, %c0_76] : memref<216x256xbf16, #tpu.memory_space<vmem>>, vector<108x256xbf16>
    %cst_77 = arith.constant dense<0.000000e+00> : vector<8x256xf32>
    %188 = tpu.matmul %186, %187, %cst_77 {dimension_numbers = #tpu.dot_dimension_numbers<[1], [0], [0], [1], [0, 0, 1, 1], [], []>} : vector<8x108xbf16>, vector<108x256xbf16>, vector<8x256xf32> -> vector<8x256xf32>
    %c0_78 = arith.constant 0 : index
    %c0_79 = arith.constant 0 : index
    %189 = vector.load %arg4[%c0_78, %c0_79] : memref<8x1xf32, #tpu.memory_space<vmem>>, vector<8x1xf32>
    %190 = vector.broadcast %189 : vector<8x1xf32> to vector<8x256xf32>
    %191 = arith.addf %188, %190 : vector<8x256xf32>
    %cst_80 = arith.constant dense<0.000000e+00> : vector<8xf32>
    %192 = vector.multi_reduction <add>, %191, %cst_80 [1] : vector<8x256xf32> to vector<8xf32>
    %193 = vector.shape_cast %192 : vector<8xf32> to vector<8x1xf32>
    %cst_81 = arith.constant 3.906250e-03 : f32
    %194 = vector.broadcast %cst_81 : f32 to vector<8x1xf32>
    %195 = arith.mulf %193, %194 : vector<8x1xf32>
    %196 = arith.mulf %191, %191 : vector<8x256xf32>
    %cst_82 = arith.constant dense<0.000000e+00> : vector<8xf32>
    %197 = vector.multi_reduction <add>, %196, %cst_82 [1] : vector<8x256xf32> to vector<8xf32>
    %198 = vector.shape_cast %197 : vector<8xf32> to vector<8x1xf32>
    %cst_83 = arith.constant 3.906250e-03 : f32
    %199 = vector.broadcast %cst_83 : f32 to vector<8x1xf32>
    %200 = arith.mulf %198, %199 : vector<8x1xf32>
    %201 = arith.mulf %195, %195 : vector<8x1xf32>
    %202 = arith.subf %200, %201 : vector<8x1xf32>
    %cst_84 = arith.constant 0.000000e+00 : f32
    %203 = vector.broadcast %cst_84 : f32 to vector<8x1xf32>
    %204 = arith.maximumf %202, %203 : vector<8x1xf32>
    %205 = vector.broadcast %195 : vector<8x1xf32> to vector<8x256xf32>
    %206 = arith.subf %191, %205 : vector<8x256xf32>
    %cst_85 = arith.constant 9.99999974E-6 : f32
    %207 = vector.broadcast %cst_85 : f32 to vector<8x1xf32>
    %208 = arith.addf %204, %207 : vector<8x1xf32>
    %209 = math.rsqrt %208 : vector<8x1xf32>
    %210 = vector.broadcast %209 : vector<8x1xf32> to vector<8x256xf32>
    %211 = arith.mulf %206, %210 : vector<8x256xf32>
    %cst_86 = arith.constant 0.000000e+00 : f32
    %212 = vector.broadcast %cst_86 : f32 to vector<8x256xf32>
    %213 = arith.cmpf ogt, %211, %212 : vector<8x256xf32>
    %cst_87 = arith.constant 0.00999999977 : f32
    %214 = vector.broadcast %cst_87 : f32 to vector<8x256xf32>
    %215 = arith.mulf %214, %211 : vector<8x256xf32>
    %216 = arith.select %213, %211, %215 : vector<8x256xi1>, vector<8x256xf32>
    %c73_i32_88 = arith.constant 73 : i32
    %217 = tpu.dynamic_rotate %216 by %c73_i32_88 dim 1 : vector<8x256xf32>, i32 -> vector<8x256xf32>
    %c0_89 = arith.constant 0 : index
    %c0_90 = arith.constant 0 : index
    %218 = vector.load %arg2[%c0_89, %c0_90] : memref<27x256xf32, #tpu.memory_space<vmem>>, vector<1x256xf32>
    %219 = vector.broadcast %218 : vector<1x256xf32> to vector<8x256xf32>
    %220 = arith.mulf %217, %219 : vector<8x256xf32>
    %221 = arith.truncf %220 : vector<8x256xf32> to vector<8x256xbf16>
    %c0_91 = arith.constant 0 : index
    %c0_92 = arith.constant 0 : index
    %222 = vector.load %arg10[%c0_91, %c0_92] : memref<216x256xbf16, #tpu.memory_space<vmem>>, vector<8x256xbf16>
    tpu.vector_store %arg10[%c0_91, %c0_92], %221 {strides = array<i32>} : memref<216x256xbf16, #tpu.memory_space<vmem>>, vector<8x256xbf16>,
    %c72_i32_93 = arith.constant 72 : i32
    %223 = tpu.dynamic_rotate %216 by %c72_i32_93 dim 1 : vector<8x256xf32>, i32 -> vector<8x256xf32>
    %c1_94 = arith.constant 1 : index
    %c0_95 = arith.constant 0 : index
    %224 = vector.load %arg2[%c1_94, %c0_95] : memref<27x256xf32, #tpu.memory_space<vmem>>, vector<1x256xf32>
    %225 = vector.broadcast %224 : vector<1x256xf32> to vector<8x256xf32>
    %226 = arith.mulf %223, %225 : vector<8x256xf32>
    %227 = arith.truncf %226 : vector<8x256xf32> to vector<8x256xbf16>
    %c8_96 = arith.constant 8 : index
    %c0_97 = arith.constant 0 : index
    %228 = vector.load %arg10[%c8_96, %c0_97] : memref<216x256xbf16, #tpu.memory_space<vmem>>, vector<8x256xbf16>
    tpu.vector_store %arg10[%c8_96, %c0_97], %227 {strides = array<i32>} : memref<216x256xbf16, #tpu.memory_space<vmem>>, vector<8x256xbf16>,
    %c71_i32_98 = arith.constant 71 : i32
    %229 = tpu.dynamic_rotate %216 by %c71_i32_98 dim 1 : vector<8x256xf32>, i32 -> vector<8x256xf32>
    %c2_99 = arith.constant 2 : index
    %c0_100 = arith.constant 0 : index
    %230 = vector.load %arg2[%c2_99, %c0_100] : memref<27x256xf32, #tpu.memory_space<vmem>>, vector<1x256xf32>
    %231 = vector.broadcast %230 : vector<1x256xf32> to vector<8x256xf32>
    %232 = arith.mulf %229, %231 : vector<8x256xf32>
    %233 = arith.truncf %232 : vector<8x256xf32> to vector<8x256xbf16>
    %c16_101 = arith.constant 16 : index
    %c0_102 = arith.constant 0 : index
    %234 = vector.load %arg10[%c16_101, %c0_102] : memref<216x256xbf16, #tpu.memory_space<vmem>>, vector<8x256xbf16>
    tpu.vector_store %arg10[%c16_101, %c0_102], %233 {strides = array<i32>} : memref<216x256xbf16, #tpu.memory_space<vmem>>, vector<8x256xbf16>,
    %c65_i32_103 = arith.constant 65 : i32
    %235 = tpu.dynamic_rotate %216 by %c65_i32_103 dim 1 : vector<8x256xf32>, i32 -> vector<8x256xf32>
    %c3_104 = arith.constant 3 : index
    %c0_105 = arith.constant 0 : index
    %236 = vector.load %arg2[%c3_104, %c0_105] : memref<27x256xf32, #tpu.memory_space<vmem>>, vector<1x256xf32>
    %237 = vector.broadcast %236 : vector<1x256xf32> to vector<8x256xf32>
    %238 = arith.mulf %235, %237 : vector<8x256xf32>
    %239 = arith.truncf %238 : vector<8x256xf32> to vector<8x256xbf16>
    %c24_106 = arith.constant 24 : index
    %c0_107 = arith.constant 0 : index
    %240 = vector.load %arg10[%c24_106, %c0_107] : memref<216x256xbf16, #tpu.memory_space<vmem>>, vector<8x256xbf16>
    tpu.vector_store %arg10[%c24_106, %c0_107], %239 {strides = array<i32>} : memref<216x256xbf16, #tpu.memory_space<vmem>>, vector<8x256xbf16>,
    %c64_i32_108 = arith.constant 64 : i32
    %241 = tpu.dynamic_rotate %216 by %c64_i32_108 dim 1 : vector<8x256xf32>, i32 -> vector<8x256xf32>
    %c4_109 = arith.constant 4 : index
    %c0_110 = arith.constant 0 : index
    %242 = vector.load %arg2[%c4_109, %c0_110] : memref<27x256xf32, #tpu.memory_space<vmem>>, vector<1x256xf32>
    %243 = vector.broadcast %242 : vector<1x256xf32> to vector<8x256xf32>
    %244 = arith.mulf %241, %243 : vector<8x256xf32>
    %245 = arith.truncf %244 : vector<8x256xf32> to vector<8x256xbf16>
    %c32_111 = arith.constant 32 : index
    %c0_112 = arith.constant 0 : index
    %246 = vector.load %arg10[%c32_111, %c0_112] : memref<216x256xbf16, #tpu.memory_space<vmem>>, vector<8x256xbf16>
    tpu.vector_store %arg10[%c32_111, %c0_112], %245 {strides = array<i32>} : memref<216x256xbf16, #tpu.memory_space<vmem>>, vector<8x256xbf16>,
    %c63_i32_113 = arith.constant 63 : i32
    %247 = tpu.dynamic_rotate %216 by %c63_i32_113 dim 1 : vector<8x256xf32>, i32 -> vector<8x256xf32>
    %c5_114 = arith.constant 5 : index
    %c0_115 = arith.constant 0 : index
    %248 = vector.load %arg2[%c5_114, %c0_115] : memref<27x256xf32, #tpu.memory_space<vmem>>, vector<1x256xf32>
    %249 = vector.broadcast %248 : vector<1x256xf32> to vector<8x256xf32>
    %250 = arith.mulf %247, %249 : vector<8x256xf32>
    %251 = arith.truncf %250 : vector<8x256xf32> to vector<8x256xbf16>
    %c40_116 = arith.constant 40 : index
    %c0_117 = arith.constant 0 : index
    %252 = vector.load %arg10[%c40_116, %c0_117] : memref<216x256xbf16, #tpu.memory_space<vmem>>, vector<8x256xbf16>
    tpu.vector_store %arg10[%c40_116, %c0_117], %251 {strides = array<i32>} : memref<216x256xbf16, #tpu.memory_space<vmem>>, vector<8x256xbf16>,
    %c57_i32_118 = arith.constant 57 : i32
    %253 = tpu.dynamic_rotate %216 by %c57_i32_118 dim 1 : vector<8x256xf32>, i32 -> vector<8x256xf32>
    %c6_119 = arith.constant 6 : index
    %c0_120 = arith.constant 0 : index
    %254 = vector.load %arg2[%c6_119, %c0_120] : memref<27x256xf32, #tpu.memory_space<vmem>>, vector<1x256xf32>
    %255 = vector.broadcast %254 : vector<1x256xf32> to vector<8x256xf32>
    %256 = arith.mulf %253, %255 : vector<8x256xf32>
    %257 = arith.truncf %256 : vector<8x256xf32> to vector<8x256xbf16>
    %c48_121 = arith.constant 48 : index
    %c0_122 = arith.constant 0 : index
    %258 = vector.load %arg10[%c48_121, %c0_122] : memref<216x256xbf16, #tpu.memory_space<vmem>>, vector<8x256xbf16>
    tpu.vector_store %arg10[%c48_121, %c0_122], %257 {strides = array<i32>} : memref<216x256xbf16, #tpu.memory_space<vmem>>, vector<8x256xbf16>,
    %c56_i32_123 = arith.constant 56 : i32
    %259 = tpu.dynamic_rotate %216 by %c56_i32_123 dim 1 : vector<8x256xf32>, i32 -> vector<8x256xf32>
    %c7_124 = arith.constant 7 : index
    %c0_125 = arith.constant 0 : index
    %260 = vector.load %arg2[%c7_124, %c0_125] : memref<27x256xf32, #tpu.memory_space<vmem>>, vector<1x256xf32>
    %261 = vector.broadcast %260 : vector<1x256xf32> to vector<8x256xf32>
    %262 = arith.mulf %259, %261 : vector<8x256xf32>
    %263 = arith.truncf %262 : vector<8x256xf32> to vector<8x256xbf16>
    %c56_126 = arith.constant 56 : index
    %c0_127 = arith.constant 0 : index
    %264 = vector.load %arg10[%c56_126, %c0_127] : memref<216x256xbf16, #tpu.memory_space<vmem>>, vector<8x256xbf16>
    tpu.vector_store %arg10[%c56_126, %c0_127], %263 {strides = array<i32>} : memref<216x256xbf16, #tpu.memory_space<vmem>>, vector<8x256xbf16>,
    %c55_i32_128 = arith.constant 55 : i32
    %265 = tpu.dynamic_rotate %216 by %c55_i32_128 dim 1 : vector<8x256xf32>, i32 -> vector<8x256xf32>
    %c8_129 = arith.constant 8 : index
    %c0_130 = arith.constant 0 : index
    %266 = vector.load %arg2[%c8_129, %c0_130] : memref<27x256xf32, #tpu.memory_space<vmem>>, vector<1x256xf32>
    %267 = vector.broadcast %266 : vector<1x256xf32> to vector<8x256xf32>
    %268 = arith.mulf %265, %267 : vector<8x256xf32>
    %269 = arith.truncf %268 : vector<8x256xf32> to vector<8x256xbf16>
    %c64_131 = arith.constant 64 : index
    %c0_132 = arith.constant 0 : index
    %270 = vector.load %arg10[%c64_131, %c0_132] : memref<216x256xbf16, #tpu.memory_space<vmem>>, vector<8x256xbf16>
    tpu.vector_store %arg10[%c64_131, %c0_132], %269 {strides = array<i32>} : memref<216x256xbf16, #tpu.memory_space<vmem>>, vector<8x256xbf16>,
    %c9_i32_133 = arith.constant 9 : i32
    %271 = tpu.dynamic_rotate %216 by %c9_i32_133 dim 1 : vector<8x256xf32>, i32 -> vector<8x256xf32>
    %c9_134 = arith.constant 9 : index
    %c0_135 = arith.constant 0 : index
    %272 = vector.load %arg2[%c9_134, %c0_135] : memref<27x256xf32, #tpu.memory_space<vmem>>, vector<1x256xf32>
    %273 = vector.broadcast %272 : vector<1x256xf32> to vector<8x256xf32>
    %274 = arith.mulf %271, %273 : vector<8x256xf32>
    %275 = arith.truncf %274 : vector<8x256xf32> to vector<8x256xbf16>
    %c72_136 = arith.constant 72 : index
    %c0_137 = arith.constant 0 : index
    %276 = vector.load %arg10[%c72_136, %c0_137] : memref<216x256xbf16, #tpu.memory_space<vmem>>, vector<8x256xbf16>
    tpu.vector_store %arg10[%c72_136, %c0_137], %275 {strides = array<i32>} : memref<216x256xbf16, #tpu.memory_space<vmem>>, vector<8x256xbf16>,
    %c8_i32_138 = arith.constant 8 : i32
    %277 = tpu.dynamic_rotate %216 by %c8_i32_138 dim 1 : vector<8x256xf32>, i32 -> vector<8x256xf32>
    %c10_139 = arith.constant 10 : index
    %c0_140 = arith.constant 0 : index
    %278 = vector.load %arg2[%c10_139, %c0_140] : memref<27x256xf32, #tpu.memory_space<vmem>>, vector<1x256xf32>
    %279 = vector.broadcast %278 : vector<1x256xf32> to vector<8x256xf32>
    %280 = arith.mulf %277, %279 : vector<8x256xf32>
    %281 = arith.truncf %280 : vector<8x256xf32> to vector<8x256xbf16>
    %c80_141 = arith.constant 80 : index
    %c0_142 = arith.constant 0 : index
    %282 = vector.load %arg10[%c80_141, %c0_142] : memref<216x256xbf16, #tpu.memory_space<vmem>>, vector<8x256xbf16>
    tpu.vector_store %arg10[%c80_141, %c0_142], %281 {strides = array<i32>} : memref<216x256xbf16, #tpu.memory_space<vmem>>, vector<8x256xbf16>,
    %c7_i32_143 = arith.constant 7 : i32
    %283 = tpu.dynamic_rotate %216 by %c7_i32_143 dim 1 : vector<8x256xf32>, i32 -> vector<8x256xf32>
    %c11_144 = arith.constant 11 : index
    %c0_145 = arith.constant 0 : index
    %284 = vector.load %arg2[%c11_144, %c0_145] : memref<27x256xf32, #tpu.memory_space<vmem>>, vector<1x256xf32>
    %285 = vector.broadcast %284 : vector<1x256xf32> to vector<8x256xf32>
    %286 = arith.mulf %283, %285 : vector<8x256xf32>
    %287 = arith.truncf %286 : vector<8x256xf32> to vector<8x256xbf16>
    %c88_146 = arith.constant 88 : index
    %c0_147 = arith.constant 0 : index
    %288 = vector.load %arg10[%c88_146, %c0_147] : memref<216x256xbf16, #tpu.memory_space<vmem>>, vector<8x256xbf16>
    tpu.vector_store %arg10[%c88_146, %c0_147], %287 {strides = array<i32>} : memref<216x256xbf16, #tpu.memory_space<vmem>>, vector<8x256xbf16>,
    %c1_i32_148 = arith.constant 1 : i32
    %289 = tpu.dynamic_rotate %216 by %c1_i32_148 dim 1 : vector<8x256xf32>, i32 -> vector<8x256xf32>
    %c12_149 = arith.constant 12 : index
    %c0_150 = arith.constant 0 : index
    %290 = vector.load %arg2[%c12_149, %c0_150] : memref<27x256xf32, #tpu.memory_space<vmem>>, vector<1x256xf32>
    %291 = vector.broadcast %290 : vector<1x256xf32> to vector<8x256xf32>
    %292 = arith.mulf %289, %291 : vector<8x256xf32>
    %293 = arith.truncf %292 : vector<8x256xf32> to vector<8x256xbf16>
    %c96_151 = arith.constant 96 : index
    %c0_152 = arith.constant 0 : index
    %294 = vector.load %arg10[%c96_151, %c0_152] : memref<216x256xbf16, #tpu.memory_space<vmem>>, vector<8x256xbf16>
    tpu.vector_store %arg10[%c96_151, %c0_152], %293 {strides = array<i32>} : memref<216x256xbf16, #tpu.memory_space<vmem>>, vector<8x256xbf16>,
    %295 = arith.truncf %216 : vector<8x256xf32> to vector<8x256xbf16>
    %c104_153 = arith.constant 104 : index
    %c0_154 = arith.constant 0 : index
    %296 = vector.load %arg10[%c104_153, %c0_154] : memref<216x256xbf16, #tpu.memory_space<vmem>>, vector<8x256xbf16>
    tpu.vector_store %arg10[%c104_153, %c0_154], %295 {strides = array<i32>} : memref<216x256xbf16, #tpu.memory_space<vmem>>, vector<8x256xbf16>,
    %c255_i32_155 = arith.constant 255 : i32
    %297 = tpu.dynamic_rotate %216 by %c255_i32_155 dim 1 : vector<8x256xf32>, i32 -> vector<8x256xf32>
    %c14_156 = arith.constant 14 : index
    %c0_157 = arith.constant 0 : index
    %298 = vector.load %arg2[%c14_156, %c0_157] : memref<27x256xf32, #tpu.memory_space<vmem>>, vector<1x256xf32>
    %299 = vector.broadcast %298 : vector<1x256xf32> to vector<8x256xf32>
    %300 = arith.mulf %297, %299 : vector<8x256xf32>
    %301 = arith.truncf %300 : vector<8x256xf32> to vector<8x256xbf16>
    %c112 = arith.constant 112 : index
    %c0_158 = arith.constant 0 : index
    %302 = vector.load %arg10[%c112, %c0_158] : memref<216x256xbf16, #tpu.memory_space<vmem>>, vector<8x256xbf16>
    tpu.vector_store %arg10[%c112, %c0_158], %301 {strides = array<i32>} : memref<216x256xbf16, #tpu.memory_space<vmem>>, vector<8x256xbf16>,
    %c249_i32_159 = arith.constant 249 : i32
    %303 = tpu.dynamic_rotate %216 by %c249_i32_159 dim 1 : vector<8x256xf32>, i32 -> vector<8x256xf32>
    %c15_160 = arith.constant 15 : index
    %c0_161 = arith.constant 0 : index
    %304 = vector.load %arg2[%c15_160, %c0_161] : memref<27x256xf32, #tpu.memory_space<vmem>>, vector<1x256xf32>
    %305 = vector.broadcast %304 : vector<1x256xf32> to vector<8x256xf32>
    %306 = arith.mulf %303, %305 : vector<8x256xf32>
    %307 = arith.truncf %306 : vector<8x256xf32> to vector<8x256xbf16>
    %c120 = arith.constant 120 : index
    %c0_162 = arith.constant 0 : index
    %308 = vector.load %arg10[%c120, %c0_162] : memref<216x256xbf16, #tpu.memory_space<vmem>>, vector<8x256xbf16>
    tpu.vector_store %arg10[%c120, %c0_162], %307 {strides = array<i32>} : memref<216x256xbf16, #tpu.memory_space<vmem>>, vector<8x256xbf16>,
    %c248_i32_163 = arith.constant 248 : i32
    %309 = tpu.dynamic_rotate %216 by %c248_i32_163 dim 1 : vector<8x256xf32>, i32 -> vector<8x256xf32>
    %c16_164 = arith.constant 16 : index
    %c0_165 = arith.constant 0 : index
    %310 = vector.load %arg2[%c16_164, %c0_165] : memref<27x256xf32, #tpu.memory_space<vmem>>, vector<1x256xf32>
    %311 = vector.broadcast %310 : vector<1x256xf32> to vector<8x256xf32>
    %312 = arith.mulf %309, %311 : vector<8x256xf32>
    %313 = arith.truncf %312 : vector<8x256xf32> to vector<8x256xbf16>
    %c128 = arith.constant 128 : index
    %c0_166 = arith.constant 0 : index
    %314 = vector.load %arg10[%c128, %c0_166] : memref<216x256xbf16, #tpu.memory_space<vmem>>, vector<8x256xbf16>
    tpu.vector_store %arg10[%c128, %c0_166], %313 {strides = array<i32>} : memref<216x256xbf16, #tpu.memory_space<vmem>>, vector<8x256xbf16>,
    %c247_i32_167 = arith.constant 247 : i32
    %315 = tpu.dynamic_rotate %216 by %c247_i32_167 dim 1 : vector<8x256xf32>, i32 -> vector<8x256xf32>
    %c17_168 = arith.constant 17 : index
    %c0_169 = arith.constant 0 : index
    %316 = vector.load %arg2[%c17_168, %c0_169] : memref<27x256xf32, #tpu.memory_space<vmem>>, vector<1x256xf32>
    %317 = vector.broadcast %316 : vector<1x256xf32> to vector<8x256xf32>
    %318 = arith.mulf %315, %317 : vector<8x256xf32>
    %319 = arith.truncf %318 : vector<8x256xf32> to vector<8x256xbf16>
    %c136 = arith.constant 136 : index
    %c0_170 = arith.constant 0 : index
    %320 = vector.load %arg10[%c136, %c0_170] : memref<216x256xbf16, #tpu.memory_space<vmem>>, vector<8x256xbf16>
    tpu.vector_store %arg10[%c136, %c0_170], %319 {strides = array<i32>} : memref<216x256xbf16, #tpu.memory_space<vmem>>, vector<8x256xbf16>,
    %c201_i32_171 = arith.constant 201 : i32
    %321 = tpu.dynamic_rotate %216 by %c201_i32_171 dim 1 : vector<8x256xf32>, i32 -> vector<8x256xf32>
    %c18_172 = arith.constant 18 : index
    %c0_173 = arith.constant 0 : index
    %322 = vector.load %arg2[%c18_172, %c0_173] : memref<27x256xf32, #tpu.memory_space<vmem>>, vector<1x256xf32>
    %323 = vector.broadcast %322 : vector<1x256xf32> to vector<8x256xf32>
    %324 = arith.mulf %321, %323 : vector<8x256xf32>
    %325 = arith.truncf %324 : vector<8x256xf32> to vector<8x256xbf16>
    %c144 = arith.constant 144 : index
    %c0_174 = arith.constant 0 : index
    %326 = vector.load %arg10[%c144, %c0_174] : memref<216x256xbf16, #tpu.memory_space<vmem>>, vector<8x256xbf16>
    tpu.vector_store %arg10[%c144, %c0_174], %325 {strides = array<i32>} : memref<216x256xbf16, #tpu.memory_space<vmem>>, vector<8x256xbf16>,
    %c200_i32_175 = arith.constant 200 : i32
    %327 = tpu.dynamic_rotate %216 by %c200_i32_175 dim 1 : vector<8x256xf32>, i32 -> vector<8x256xf32>
    %c19_176 = arith.constant 19 : index
    %c0_177 = arith.constant 0 : index
    %328 = vector.load %arg2[%c19_176, %c0_177] : memref<27x256xf32, #tpu.memory_space<vmem>>, vector<1x256xf32>
    %329 = vector.broadcast %328 : vector<1x256xf32> to vector<8x256xf32>
    %330 = arith.mulf %327, %329 : vector<8x256xf32>
    %331 = arith.truncf %330 : vector<8x256xf32> to vector<8x256xbf16>
    %c152 = arith.constant 152 : index
    %c0_178 = arith.constant 0 : index
    %332 = vector.load %arg10[%c152, %c0_178] : memref<216x256xbf16, #tpu.memory_space<vmem>>, vector<8x256xbf16>
    tpu.vector_store %arg10[%c152, %c0_178], %331 {strides = array<i32>} : memref<216x256xbf16, #tpu.memory_space<vmem>>, vector<8x256xbf16>,
    %c199_i32_179 = arith.constant 199 : i32
    %333 = tpu.dynamic_rotate %216 by %c199_i32_179 dim 1 : vector<8x256xf32>, i32 -> vector<8x256xf32>
    %c20_180 = arith.constant 20 : index
    %c0_181 = arith.constant 0 : index
    %334 = vector.load %arg2[%c20_180, %c0_181] : memref<27x256xf32, #tpu.memory_space<vmem>>, vector<1x256xf32>
    %335 = vector.broadcast %334 : vector<1x256xf32> to vector<8x256xf32>
    %336 = arith.mulf %333, %335 : vector<8x256xf32>
    %337 = arith.truncf %336 : vector<8x256xf32> to vector<8x256xbf16>
    %c160 = arith.constant 160 : index
    %c0_182 = arith.constant 0 : index
    %338 = vector.load %arg10[%c160, %c0_182] : memref<216x256xbf16, #tpu.memory_space<vmem>>, vector<8x256xbf16>
    tpu.vector_store %arg10[%c160, %c0_182], %337 {strides = array<i32>} : memref<216x256xbf16, #tpu.memory_space<vmem>>, vector<8x256xbf16>,
    %c193_i32_183 = arith.constant 193 : i32
    %339 = tpu.dynamic_rotate %216 by %c193_i32_183 dim 1 : vector<8x256xf32>, i32 -> vector<8x256xf32>
    %c21_184 = arith.constant 21 : index
    %c0_185 = arith.constant 0 : index
    %340 = vector.load %arg2[%c21_184, %c0_185] : memref<27x256xf32, #tpu.memory_space<vmem>>, vector<1x256xf32>
    %341 = vector.broadcast %340 : vector<1x256xf32> to vector<8x256xf32>
    %342 = arith.mulf %339, %341 : vector<8x256xf32>
    %343 = arith.truncf %342 : vector<8x256xf32> to vector<8x256xbf16>
    %c168 = arith.constant 168 : index
    %c0_186 = arith.constant 0 : index
    %344 = vector.load %arg10[%c168, %c0_186] : memref<216x256xbf16, #tpu.memory_space<vmem>>, vector<8x256xbf16>
    tpu.vector_store %arg10[%c168, %c0_186], %343 {strides = array<i32>} : memref<216x256xbf16, #tpu.memory_space<vmem>>, vector<8x256xbf16>,
    %c192_i32_187 = arith.constant 192 : i32
    %345 = tpu.dynamic_rotate %216 by %c192_i32_187 dim 1 : vector<8x256xf32>, i32 -> vector<8x256xf32>
    %c22_188 = arith.constant 22 : index
    %c0_189 = arith.constant 0 : index
    %346 = vector.load %arg2[%c22_188, %c0_189] : memref<27x256xf32, #tpu.memory_space<vmem>>, vector<1x256xf32>
    %347 = vector.broadcast %346 : vector<1x256xf32> to vector<8x256xf32>
    %348 = arith.mulf %345, %347 : vector<8x256xf32>
    %349 = arith.truncf %348 : vector<8x256xf32> to vector<8x256xbf16>
    %c176 = arith.constant 176 : index
    %c0_190 = arith.constant 0 : index
    %350 = vector.load %arg10[%c176, %c0_190] : memref<216x256xbf16, #tpu.memory_space<vmem>>, vector<8x256xbf16>
    tpu.vector_store %arg10[%c176, %c0_190], %349 {strides = array<i32>} : memref<216x256xbf16, #tpu.memory_space<vmem>>, vector<8x256xbf16>,
    %c191_i32_191 = arith.constant 191 : i32
    %351 = tpu.dynamic_rotate %216 by %c191_i32_191 dim 1 : vector<8x256xf32>, i32 -> vector<8x256xf32>
    %c23_192 = arith.constant 23 : index
    %c0_193 = arith.constant 0 : index
    %352 = vector.load %arg2[%c23_192, %c0_193] : memref<27x256xf32, #tpu.memory_space<vmem>>, vector<1x256xf32>
    %353 = vector.broadcast %352 : vector<1x256xf32> to vector<8x256xf32>
    %354 = arith.mulf %351, %353 : vector<8x256xf32>
    %355 = arith.truncf %354 : vector<8x256xf32> to vector<8x256xbf16>
    %c184 = arith.constant 184 : index
    %c0_194 = arith.constant 0 : index
    %356 = vector.load %arg10[%c184, %c0_194] : memref<216x256xbf16, #tpu.memory_space<vmem>>, vector<8x256xbf16>
    tpu.vector_store %arg10[%c184, %c0_194], %355 {strides = array<i32>} : memref<216x256xbf16, #tpu.memory_space<vmem>>, vector<8x256xbf16>,
    %c185_i32_195 = arith.constant 185 : i32
    %357 = tpu.dynamic_rotate %216 by %c185_i32_195 dim 1 : vector<8x256xf32>, i32 -> vector<8x256xf32>
    %c24_196 = arith.constant 24 : index
    %c0_197 = arith.constant 0 : index
    %358 = vector.load %arg2[%c24_196, %c0_197] : memref<27x256xf32, #tpu.memory_space<vmem>>, vector<1x256xf32>
    %359 = vector.broadcast %358 : vector<1x256xf32> to vector<8x256xf32>
    %360 = arith.mulf %357, %359 : vector<8x256xf32>
    %361 = arith.truncf %360 : vector<8x256xf32> to vector<8x256xbf16>
    %c192 = arith.constant 192 : index
    %c0_198 = arith.constant 0 : index
    %362 = vector.load %arg10[%c192, %c0_198] : memref<216x256xbf16, #tpu.memory_space<vmem>>, vector<8x256xbf16>
    tpu.vector_store %arg10[%c192, %c0_198], %361 {strides = array<i32>} : memref<216x256xbf16, #tpu.memory_space<vmem>>, vector<8x256xbf16>,
    %c184_i32_199 = arith.constant 184 : i32
    %363 = tpu.dynamic_rotate %216 by %c184_i32_199 dim 1 : vector<8x256xf32>, i32 -> vector<8x256xf32>
    %c25_200 = arith.constant 25 : index
    %c0_201 = arith.constant 0 : index
    %364 = vector.load %arg2[%c25_200, %c0_201] : memref<27x256xf32, #tpu.memory_space<vmem>>, vector<1x256xf32>
    %365 = vector.broadcast %364 : vector<1x256xf32> to vector<8x256xf32>
    %366 = arith.mulf %363, %365 : vector<8x256xf32>
    %367 = arith.truncf %366 : vector<8x256xf32> to vector<8x256xbf16>
    %c200 = arith.constant 200 : index
    %c0_202 = arith.constant 0 : index
    %368 = vector.load %arg10[%c200, %c0_202] : memref<216x256xbf16, #tpu.memory_space<vmem>>, vector<8x256xbf16>
    tpu.vector_store %arg10[%c200, %c0_202], %367 {strides = array<i32>} : memref<216x256xbf16, #tpu.memory_space<vmem>>, vector<8x256xbf16>,
    %c183_i32_203 = arith.constant 183 : i32
    %369 = tpu.dynamic_rotate %216 by %c183_i32_203 dim 1 : vector<8x256xf32>, i32 -> vector<8x256xf32>
    %c26_204 = arith.constant 26 : index
    %c0_205 = arith.constant 0 : index
    %370 = vector.load %arg2[%c26_204, %c0_205] : memref<27x256xf32, #tpu.memory_space<vmem>>, vector<1x256xf32>
    %371 = vector.broadcast %370 : vector<1x256xf32> to vector<8x256xf32>
    %372 = arith.mulf %369, %371 : vector<8x256xf32>
    %373 = arith.truncf %372 : vector<8x256xf32> to vector<8x256xbf16>
    %c208 = arith.constant 208 : index
    %c0_206 = arith.constant 0 : index
    %374 = vector.load %arg10[%c208, %c0_206] : memref<216x256xbf16, #tpu.memory_space<vmem>>, vector<8x256xbf16>
    tpu.vector_store %arg10[%c208, %c0_206], %373 {strides = array<i32>} : memref<216x256xbf16, #tpu.memory_space<vmem>>, vector<8x256xbf16>,
    %c0_207 = arith.constant 0 : index
    %c0_208 = arith.constant 0 : index
    %375 = vector.load %arg5[%c0_207, %c0_208] : memref<8x216xbf16, #tpu.memory_space<vmem>>, vector<8x216xbf16>
    %c0_209 = arith.constant 0 : index
    %c0_210 = arith.constant 0 : index
    %376 = vector.load %arg10[%c0_209, %c0_210] : memref<216x256xbf16, #tpu.memory_space<vmem>>, vector<216x256xbf16>
    %cst_211 = arith.constant dense<0.000000e+00> : vector<8x256xf32>
    %377 = tpu.matmul %375, %376, %cst_211 {dimension_numbers = #tpu.dot_dimension_numbers<[1], [0], [0], [1], [0, 0, 1, 1], [], []>} : vector<8x216xbf16>, vector<216x256xbf16>, vector<8x256xf32> -> vector<8x256xf32>
    %c0_212 = arith.constant 0 : index
    %c0_213 = arith.constant 0 : index
    %378 = vector.load %arg6[%c0_212, %c0_213] : memref<8x1xf32, #tpu.memory_space<vmem>>, vector<8x1xf32>
    %379 = vector.broadcast %378 : vector<8x1xf32> to vector<8x256xf32>
    %380 = arith.addf %377, %379 : vector<8x256xf32>
    %cst_214 = arith.constant dense<0.000000e+00> : vector<8xf32>
    %381 = vector.multi_reduction <add>, %380, %cst_214 [1] : vector<8x256xf32> to vector<8xf32>
    %382 = vector.shape_cast %381 : vector<8xf32> to vector<8x1xf32>
    %cst_215 = arith.constant 3.906250e-03 : f32
    %383 = vector.broadcast %cst_215 : f32 to vector<8x1xf32>
    %384 = arith.mulf %382, %383 : vector<8x1xf32>
    %385 = arith.mulf %380, %380 : vector<8x256xf32>
    %cst_216 = arith.constant dense<0.000000e+00> : vector<8xf32>
    %386 = vector.multi_reduction <add>, %385, %cst_216 [1] : vector<8x256xf32> to vector<8xf32>
    %387 = vector.shape_cast %386 : vector<8xf32> to vector<8x1xf32>
    %cst_217 = arith.constant 3.906250e-03 : f32
    %388 = vector.broadcast %cst_217 : f32 to vector<8x1xf32>
    %389 = arith.mulf %387, %388 : vector<8x1xf32>
    %390 = arith.mulf %384, %384 : vector<8x1xf32>
    %391 = arith.subf %389, %390 : vector<8x1xf32>
    %cst_218 = arith.constant 0.000000e+00 : f32
    %392 = vector.broadcast %cst_218 : f32 to vector<8x1xf32>
    %393 = arith.maximumf %391, %392 : vector<8x1xf32>
    %394 = vector.broadcast %384 : vector<8x1xf32> to vector<8x256xf32>
    %395 = arith.subf %380, %394 : vector<8x256xf32>
    %cst_219 = arith.constant 9.99999974E-6 : f32
    %396 = vector.broadcast %cst_219 : f32 to vector<8x1xf32>
    %397 = arith.addf %393, %396 : vector<8x1xf32>
    %398 = math.rsqrt %397 : vector<8x1xf32>
    %399 = vector.broadcast %398 : vector<8x1xf32> to vector<8x256xf32>
    %400 = arith.mulf %395, %399 : vector<8x256xf32>
    %401 = arith.addf %400, %27 : vector<8x256xf32>
    %cst_220 = arith.constant 0.000000e+00 : f32
    %402 = vector.broadcast %cst_220 : f32 to vector<8x256xf32>
    %403 = arith.cmpf ogt, %401, %402 : vector<8x256xf32>
    %cst_221 = arith.constant 0.00999999977 : f32
    %404 = vector.broadcast %cst_221 : f32 to vector<8x256xf32>
    %405 = arith.mulf %404, %401 : vector<8x256xf32>
    %406 = arith.select %403, %401, %405 : vector<8x256xi1>, vector<8x256xf32>
    %c0_222 = arith.constant 0 : index
    %c0_223 = arith.constant 0 : index
    %c0_224 = arith.constant 0 : index
    %407 = vector.load %arg9[%c0_222, %c0_223, %c0_224] : memref<1x8x256xf32, #tpu.memory_space<vmem>>, vector<1x8x256xf32>
    %408 = vector.shape_cast %407 : vector<1x8x256xf32> to vector<8x256xf32>
    %409 = vector.shape_cast %406 : vector<8x256xf32> to vector<1x8x256xf32>
    tpu.vector_store %arg9[%c0_222, %c0_223, %c0_224], %409 {strides = array<i32>} : memref<1x8x256xf32, #tpu.memory_space<vmem>>, vector<1x8x256xf32>,
    return
  }
  func.func @transform_0(%arg0: i32) -> (i32, i32, i32) {
    %c0_i32 = arith.constant 0 : i32
    %c0_i32_0 = arith.constant 0 : i32
    %c0_i32_1 = arith.constant 0 : i32
    return %arg0, %c0_i32, %c0_i32_0 : i32, i32, i32
  }
  func.func @transform_1(%arg0: i32) -> (i32, i32) {
    %c0_i32 = arith.constant 0 : i32
    %c0_i32_0 = arith.constant 0 : i32
    %c0_i32_1 = arith.constant 0 : i32
    return %c0_i32, %c0_i32_0 : i32, i32
  }
  func.func @transform_2(%arg0: i32) -> (i32, i32) {
    %c0_i32 = arith.constant 0 : i32
    %c0_i32_0 = arith.constant 0 : i32
    %c0_i32_1 = arith.constant 0 : i32
    return %c0_i32, %c0_i32_0 : i32, i32
  }
  func.func @transform_3(%arg0: i32) -> (i32, i32) {
    %c0_i32 = arith.constant 0 : i32
    %c0_i32_0 = arith.constant 0 : i32
    %c0_i32_1 = arith.constant 0 : i32
    return %c0_i32, %c0_i32_0 : i32, i32
  }
  func.func @transform_4(%arg0: i32) -> (i32, i32) {
    %c0_i32 = arith.constant 0 : i32
    %c0_i32_0 = arith.constant 0 : i32
    %c0_i32_1 = arith.constant 0 : i32
    return %c0_i32, %c0_i32_0 : i32, i32
  }
  func.func @transform_5(%arg0: i32) -> (i32, i32) {
    %c0_i32 = arith.constant 0 : i32
    %c0_i32_0 = arith.constant 0 : i32
    %c0_i32_1 = arith.constant 0 : i32
    return %c0_i32, %c0_i32_0 : i32, i32
  }
  func.func @transform_6(%arg0: i32) -> (i32, i32) {
    %c0_i32 = arith.constant 0 : i32
    %c0_i32_0 = arith.constant 0 : i32
    %c0_i32_1 = arith.constant 0 : i32
    return %c0_i32, %c0_i32_0 : i32, i32
  }
  func.func @transform_7(%arg0: i32) -> (i32, i32) {
    %c0_i32 = arith.constant 0 : i32
    %c0_i32_0 = arith.constant 0 : i32
    %c0_i32_1 = arith.constant 0 : i32
    return %c0_i32, %c0_i32_0 : i32, i32
  }
  func.func @transform_8(%arg0: i32) -> (i32, i32, i32) {
    %c0_i32 = arith.constant 0 : i32
    %c0_i32_0 = arith.constant 0 : i32
    %c0_i32_1 = arith.constant 0 : i32
    return %arg0, %c0_i32, %c0_i32_0 : i32, i32, i32
  }
}

</mosaic_0001>

<bundles_post_ra>
// kernel: basic_block_pallas.1
= control target key start
LH: loop header
LB: loop body
LE: loop exit
PB: predicated region body
PF: predicated region fallthrough
CT: control target
= control target key end

     0   :  { %s2251_s27 = smov 0   ;;  %s2849_s0 = inlined_call_operand.vmem [shape: f32[2,4,256], index: 0, kind: input, shape index: {}]   ;;  %s2850_s1 = inlined_call_operand.vmem [shape: f32[27,256], index: 1, kind: input, shape index: {}]   ;;  %s2851_s2 = inlined_call_operand.vmem [shape: bf16[8,108], index: 2, kind: input, shape index: {}]   ;;  %s2852_s3 = inlined_call_operand.vmem [shape: f32[8,1], index: 3, kind: input, shape index: {}]   ;;  %s2853_s4 = inlined_call_operand.vmem [shape: bf16[8,216], index: 4, kind: input, shape index: {}]   ;;  %s2854_s5 = inlined_call_operand.vmem [shape: f32[8,1], index: 5, kind: input, shape index: {}]   ;;  %s2855_s6 = inlined_call_operand.vmem [shape: bf16[8,4], index: 6, kind: input, shape index: {}]   ;;  %s2856_s7 = inlined_call_operand.vmem [shape: f32[8,1], index: 7, kind: input, shape index: {}]   ;;  %s2857_s8 = inlined_call_operand.vmem [shape: f32[2,8,256], index: 8, kind: output, shape index: {}]  }
   0x1 LB: > { %s1876_s28 = sadd.s32 4294967295, %s2186_s27   ;;  %p1880_p0 = scmp.ge.s32.totalorder %s2186_s27, 1  ;;  %s2186_s27 = sphi %s2251_s27, %s18_s27  }
   0x2   : > { %p262_p1 = scmp.lt.s32.totalorder %s2186_s27, 3 }
   0x4   : > { %p263_p2 = pnand %p1880_p0, %p262_p1 }
   0x5   : > { %p296_p3 = scmp.lt.s32.totalorder (!%p263_p2), %s1876_s28, 1  ;;  %s2188_s11 = smov (!%p263_p2), 63  }
   0x6   : > { %266 = sbr.rel (%p263_p2) target bundleno = 1224 (0x4c8), region = 52  ;;  %s2189_s12 = smov (!%p263_p2), 56  }
   0x7   : > { %s2190_s13 = smov (!%p263_p2), 55   ;;  %s2191_s14 = smov (!%p263_p2), 9  }
   0x8   : > { %s2192_s15 = smov (!%p263_p2), 8   ;;  %s2193_s16 = smov (!%p263_p2), 7  }
   0x9   : > { %s2194_s17 = smov (!%p263_p2), 1   ;;  %s2195_s18 = smov (!%p263_p2), 127  }
   0xa   : > { %s2196_s19 = smov (!%p263_p2), 121   ;;  %s2858_s20 = smov (!%p263_p2), 120  }
   0xb   : > { %s2880_s28 = smov (!%p296_p3, %s1876_s28), 1  ;;  %s2198_s21 = smov 119   ;;  %v401_v46 = vlaneseq  ;;  %v1891_v47 = vld [vmem:[%s2850_s1 + $0x5] ss:$8 sm:$0x3] }
   0xc   : > { %s2103_s29 = sshll.u32 %s2880_s28, 3  ;;  %s2199_s22 = smov 73   ;;  %v529_v49 = vperm.slane %v1891_v47, 0  ;;  %v530_v50 = vperm.slane %v1891_v47, 1 }
   0xd   : > { %s300_s10 = scalar_lea.vmem %s2849_s0, %s2103_s29  ;;  %s2200_s23 = smov 72   ;;  %v2351_v48 = vand.u32 127, %v401_v46  ;;  %v1893_v60 = vld [vmem:[%s2850_s1 + $0x7] ss:$8 sm:$0x3] }
   0xe   : > { %v2265_v0 = vld [vmem:[%s300_s10] sm:$0xff]  ;;  %s2201_s24 = smov 71   ;;  %s2202_s25 = smov 65   ;;  %v578_v61 = vperm.slane %v1893_v60, 0  ;;  %v579_v62 = vperm.slane %v1893_v60, 1 }
   0xf   : > { %309 = vst [vmem:[#allocation1] ss:$2 sm:$0xff] %v2265_v0  ;;  %vm2865_vm0 = vcmp.lt.s32.totalorder %v2351_v48, 63  ;;  %s2203_s30 = smov 64   ;;  %vm572_vm1 = vcmp.lt.s32.totalorder %v2351_v48, 56  ;;  %vm598_vm2 = vcmp.lt.s32.totalorder %v2351_v48, 55 }
  0x10   : > { %s2204_s26 = smov 57   ;;  %vm2864_vm3 = vcmp.lt.s32.totalorder %v2351_v48, 9  ;;  %vm647_vm4 = vcmp.lt.s32.totalorder %v2351_v48, 8  ;;  %vm670_vm5 = vcmp.lt.s32.totalorder %v2351_v48, 7  ;;  %vm696_vm6 = vcmp.lt.s32.totalorder %v2351_v48, 1 }
  0x11   : > { %vm722_vm7 = vcmp.lt.s32.totalorder %v2351_v48, 127  ;;  %vm745_vm8 = vcmp.lt.s32.totalorder %v2351_v48, 121  ;;  %vm2861_vm9 = vcmp.lt.s32.totalorder %v2351_v48, 120  ;;  %vm2860_vm10 = vcmp.lt.s32.totalorder %v2351_v48, 119 }
  0x12   : > { %vm2862_vm11 = vcmp.lt.s32.totalorder %v2351_v48, 73  ;;  %vm425_vm12 = vcmp.lt.s32.totalorder %v2351_v48, 72  ;;  %vm451_vm13 = vcmp.lt.s32.totalorder %v2351_v48, 71  ;;  %vm2863_vm14 = vcmp.lt.s32.totalorder %v2351_v48, 65 }
  0x13   : > { %vm500_vm15 = vcmp.lt.s32.totalorder %v2351_v48, 64 }
  0x16   : > { %v2268_v1 = vld.sshfl [vmem:[#allocation1] sm:$0xff pattern:$0x75316420]  ;;  %v2270_v2 = vld.sshfl [vmem:[#allocation1 + $0x8] sm:$0xff pattern:$0x75316420] }
  0x17   : > { %392 = vst [vmem:[#allocation1] ss:$2 sm:$0xff] %v2265_v0 }
  0x1e   : > { %v2273_v3 = vld.sshfl [vmem:[#allocation1] sm:$0xff pattern:$0x75316420]  ;;  %v2275_v4 = vld.sshfl [vmem:[#allocation1 + $0x8] sm:$0xff pattern:$0x75316420] }
  0x1f   : > { %416 = vst [vmem:[#allocation1] ss:$2 sm:$0xff] %v2265_v0 }
  0x26   : > { %v2278_v5 = vld.sshfl [vmem:[#allocation1] sm:$0xff pattern:$0x75316420]  ;;  %v2280_v6 = vld.sshfl [vmem:[#allocation1 + $0x8] sm:$0xff pattern:$0x75316420] }
  0x27   : > { %442 = vst [vmem:[#allocation1] ss:$2 sm:$0xff] %v2265_v0 }
  0x2e   : > { %v2283_v7 = vld.sshfl [vmem:[#allocation1] sm:$0xff pattern:$0x75316420]  ;;  %v2285_v8 = vld.sshfl [vmem:[#allocation1 + $0x8] sm:$0xff pattern:$0x75316420] }
  0x2f   : > { %465 = vst [vmem:[#allocation1] ss:$2 sm:$0xff] %v2265_v0 }
  0x36   : > { %v2288_v9 = vld.sshfl [vmem:[#allocation1] sm:$0xff pattern:$0x75316420]  ;;  %v2290_v10 = vld.sshfl [vmem:[#allocation1 + $0x8] sm:$0xff pattern:$0x75316420] }
  0x37   : > { %491 = vst [vmem:[#allocation1] ss:$2 sm:$0xff] %v2265_v0 }
  0x3e   : > { %v2293_v11 = vld.sshfl [vmem:[#allocation1] sm:$0xff pattern:$0x75316420]  ;;  %v2295_v12 = vld.sshfl [vmem:[#allocation1 + $0x8] sm:$0xff pattern:$0x75316420] }
  0x3f   : > { %514 = vst [vmem:[#allocation1] ss:$2 sm:$0xff] %v2265_v0 }
  0x46   : > { %v515_v13 = vld.sshfl [vmem:[#allocation1] sm:$0xff pattern:$0x75316420]  ;;  %v516_v14 = vld.sshfl [vmem:[#allocation1 + $0x8] sm:$0xff pattern:$0x75316420] }
  0x47   : > { %519 = vrot.lane.b32.xlu0 %v515_v13, %s2188_s11  ;;  %521 = vrot.lane.b32.xlu1 %v516_v14, %s2188_s11  ;;  %540 = vst [vmem:[#allocation1] ss:$2 sm:$0xff] %v2265_v0 }
  0x4e   : > { %v2301_v15 = vld.sshfl [vmem:[#allocation1] sm:$0xff pattern:$0x75316420]  ;;  %v2303_v16 = vld.sshfl [vmem:[#allocation1 + $0x8] sm:$0xff pattern:$0x75316420] }
  0x4f   : > { %563 = vst [vmem:[#allocation1] ss:$2 sm:$0xff] %v2265_v0 }
  0x56   : > { %v565_v17 = vld.sshfl [vmem:[#allocation1 + $0x8] sm:$0xff pattern:$0x75316420]  ;;  %v564_v18 = vld.sshfl [vmem:[#allocation1] sm:$0xff pattern:$0x75316420] }
  0x57   : > { %570 = vrot.lane.b32.xlu0 %v565_v17, %s2189_s12  ;;  %589 = vst [vmem:[#allocation1] ss:$2 sm:$0xff] %v2265_v0  ;;  %568 = vrot.lane.b32.xlu2 %v564_v18, %s2189_s12 }
  0x5e   : > { %v590_v19 = vld.sshfl [vmem:[#allocation1] sm:$0xff pattern:$0x75316420]  ;;  %v591_v20 = vld.sshfl [vmem:[#allocation1 + $0x8] sm:$0xff pattern:$0x75316420] }
  0x5f   : > { %612 = vst [vmem:[#allocation1] ss:$2 sm:$0xff] %v2265_v0  ;;  %596 = vrot.lane.b32.xlu0 %v591_v20, %s2190_s13  ;;  %594 = vrot.lane.b32.xlu2 %v590_v19, %s2190_s13 }
  0x66   : > { %v613_v21 = vld.sshfl [vmem:[#allocation1] sm:$0xff pattern:$0x75316420]  ;;  %v614_v22 = vld.sshfl [vmem:[#allocation1 + $0x8] sm:$0xff pattern:$0x75316420] }
  0x67   : > { %617 = vrot.lane.b32.xlu1 %v613_v21, %s2191_s14  ;;  %638 = vst [vmem:[#allocation1] ss:$2 sm:$0xff] %v2265_v0  ;;  %619 = vrot.lane.b32.xlu2 %v614_v22, %s2191_s14 }
  0x6e   : > { %v639_v23 = vld.sshfl [vmem:[#allocation1] sm:$0xff pattern:$0x75316420]  ;;  %v640_v24 = vld.sshfl [vmem:[#allocation1 + $0x8] sm:$0xff pattern:$0x75316420] }
  0x6f   : > { %643 = vrot.lane.b32.xlu1 %v639_v23, %s2192_s15  ;;  %661 = vst [vmem:[#allocation1] ss:$2 sm:$0xff] %v2265_v0  ;;  %645 = vrot.lane.b32.xlu2 %v640_v24, %s2192_s15 }
  0x76   : > { %v662_v25 = vld.sshfl [vmem:[#allocation1] sm:$0xff pattern:$0x75316420]  ;;  %v663_v26 = vld.sshfl [vmem:[#allocation1 + $0x8] sm:$0xff pattern:$0x75316420] }
  0x77   : > { %666 = vrot.lane.b32.xlu0 %v662_v25, %s2193_s16  ;;  %668 = vrot.lane.b32.xlu1 %v663_v26, %s2193_s16  ;;  %687 = vst [vmem:[#allocation1] ss:$2 sm:$0xff] %v2265_v0  ;;  %v1894_v25 = vld [vmem:[%s2850_s1 + $0x10] ss:$8 sm:$0x3] }
  0x78   : > { %v604_v26 = vperm.slane %v1894_v25, 0 }
  0x7e   : > { %v688_v27 = vld.sshfl [vmem:[#allocation1] sm:$0xff pattern:$0x75316420]  ;;  %v689_v28 = vld.sshfl [vmem:[#allocation1 + $0x8] sm:$0xff pattern:$0x75316420] }
  0x7f   : > { %692 = vrot.lane.b32.xlu0 %v688_v27, %s2194_s17  ;;  %694 = vrot.lane.b32.xlu1 %v689_v28, %s2194_s17  ;;  %713 = vst [vmem:[#allocation1] ss:$2 sm:$0xff] %v2265_v0  ;;  %v605_v27 = vperm.slane %v1894_v25, 1 }
  0x86   : > { %v715_v29 = vld.sshfl [vmem:[#allocation1 + $0x8] sm:$0xff pattern:$0x75316420]  ;;  %v714_v30 = vld.sshfl [vmem:[#allocation1] sm:$0xff pattern:$0x75316420] }
  0x87   : > { %720 = vrot.lane.b32.xlu0 %v715_v29, %s2195_s18  ;;  %736 = vst [vmem:[#allocation1] ss:$2 sm:$0xff] %v2265_v0  ;;  %718 = vrot.lane.b32.xlu2 %v714_v30, %s2195_s18 }
  0x8e   : > { %v737_v31 = vld.sshfl [vmem:[#allocation1] sm:$0xff pattern:$0x75316420]  ;;  %v738_v32 = vld.sshfl [vmem:[#allocation1 + $0x8] sm:$0xff pattern:$0x75316420] }
  0x8f   : > { %741 = vrot.lane.b32.xlu1 %v737_v31, %s2196_s19  ;;  %762 = vst [vmem:[#allocation1] ss:$2 sm:$0xff] %v2265_v0  ;;  %743 = vrot.lane.b32.xlu2 %v738_v32, %s2196_s19 }
  0x96   : > { %v763_v33 = vld.sshfl [vmem:[#allocation1] sm:$0xff pattern:$0x75316420]  ;;  %v764_v34 = vld.sshfl [vmem:[#allocation1 + $0x8] sm:$0xff pattern:$0x75316420] }
  0x97   : > { %767 = vrot.lane.b32.xlu0 %v763_v33, %s2858_s20  ;;  %769 = vrot.lane.b32.xlu1 %v764_v34, %s2858_s20  ;;  %785 = vst [vmem:[#allocation1] ss:$2 sm:$0xff] %v2265_v0  ;;  %v1895_v33 = vld [vmem:[%s2850_s1 + $0x11] ss:$8 sm:$0x3] }
  0x9e   : > { %v787_v35 = vld.sshfl [vmem:[#allocation1 + $0x8] sm:$0xff pattern:$0x75316420]  ;;  %v786_v36 = vld.sshfl [vmem:[#allocation1] sm:$0xff pattern:$0x75316420] }
  0x9f   : > { %792 = vrot.lane.b32.xlu0 %v787_v35, %s2198_s21  ;;  %811 = vst [vmem:[#allocation1] ss:$2 sm:$0xff] %v2265_v0  ;;  %790 = vrot.lane.b32.xlu2 %v786_v36, %s2198_s21 }
  0xa6   : > { %v812_v37 = vld.sshfl [vmem:[#allocation1] sm:$0xff pattern:$0x75316420]  ;;  %v813_v38 = vld.sshfl [vmem:[#allocation1 + $0x8] sm:$0xff pattern:$0x75316420] }
  0xa7   : > { %833 = vst [vmem:[#allocation1] ss:$2 sm:$0xff] %v2265_v0  ;;  %818 = vrot.lane.b32.xlu0 %v813_v38, %s2199_s22  ;;  %816 = vrot.lane.b32.xlu2 %v812_v37, %s2199_s22  ;;  %v627_v37 = vperm.slane %v1895_v33, 0  ;;  %v628_v38 = vperm.slane %v1895_v33, 1 }
  0xae   : > { %v834_v39 = vld.sshfl [vmem:[#allocation1] sm:$0xff pattern:$0x75316420]  ;;  %v835_v40 = vld.sshfl [vmem:[#allocation1 + $0x8] sm:$0xff pattern:$0x75316420] }
  0xaf   : > { %838 = vrot.lane.b32.xlu1 %v834_v39, %s2200_s23  ;;  %858 = vst [vmem:[#allocation1] ss:$2 sm:$0xff] %v2265_v0  ;;  %840 = vrot.lane.b32.xlu2 %v835_v40, %s2200_s23 }
  0xb1   : > { %v569_v51 = vpop.permute.xlu2 %568 }
  0xb6   : > { %v859_v41 = vld.sshfl [vmem:[#allocation1] sm:$0xff pattern:$0x75316420]  ;;  %v860_v42 = vld.sshfl [vmem:[#allocation1 + $0x8] sm:$0xff pattern:$0x75316420] }
  0xb7   : > { %863 = vrot.lane.b32.xlu1 %v859_v41, %s2201_s24  ;;  %880 = vst [vmem:[#allocation1] ss:$2 sm:$0xff] %v2265_v0  ;;  %865 = vrot.lane.b32.xlu2 %v860_v42, %s2201_s24 }
  0xb9   : > { %v520_v45 = vpop.permute.xlu0 %519  ;;  %v522_v52 = vpop.permute.xlu1 %521 }
  0xba   : > { %v524_v53 = vsel %vm2865_vm0, %v520_v45, %v522_v52  ;;  %v525_v54 = vsel %vm2865_vm0, %v522_v52, %v520_v45  ;;  %v595_v20 = vpop.permute.xlu2 %594  ;;  %v1896_v45 = vld [vmem:[%s2850_s1 + $0x12] ss:$8 sm:$0x3] }
  0xbb   : > { %v533_v55 = vmul.f32 %v529_v49, %v525_v54  ;;  %v534_v56 = vmul.f32 %v530_v50, %v524_v53  ;;  %v654_v52 = vperm.slane %v1896_v45, 1 }
  0xbd   : > { %v535_v59 = vpack.c.bf16 %v534_v56, %v533_v55 }
  0xbe   : > { %v881_v43 = vld.sshfl [vmem:[#allocation1] sm:$0xff pattern:$0x75316420]  ;;  %v882_v44 = vld.sshfl [vmem:[#allocation1 + $0x8] sm:$0xff pattern:$0x75316420] }
  0xbf   : > { %885 = vrot.lane.b32.xlu0 %v881_v43, %s2202_s25  ;;  %887 = vrot.lane.b32.xlu1 %v882_v44, %s2202_s25  ;;  %905 = vst [vmem:[#allocation1] ss:$2 sm:$0xff] %v2265_v0  ;;  %v537_v63 = vrot.slane %v535_v59, 6 }
  0xc1   : > { %539 = vst [vmem:[#allocation2 + $0x10] sm:$0xcc] %v537_v63 }
  0xc2   : > { %v620_v39 = vpop.permute.xlu2 %619 }
  0xc6   : > { %v906_v57 = vld.sshfl [vmem:[#allocation1] sm:$0xff pattern:$0x75316420]  ;;  %v907_v58 = vld.sshfl [vmem:[#allocation1 + $0x8] sm:$0xff pattern:$0x75316420] }
  0xc7   : > { %910 = vrot.lane.b32.xlu0 %v906_v57, %s2203_s30  ;;  %912 = vrot.lane.b32.xlu1 %v907_v58, %s2203_s30  ;;  %927 = vst [vmem:[#allocation1] ss:$2 sm:$0xff] %v2265_v0 }
  0xc9   : > { %v571_v13 = vpop.permute.xlu0 %570 }
  0xca   : > { %v573_v14 = vsel %vm572_vm1, %v569_v51, %v571_v13  ;;  %v574_v17 = vsel %vm572_vm1, %v571_v13, %v569_v51  ;;  %v653_v51 = vperm.slane %v1896_v45, 0  ;;  %v646_v54 = vpop.permute.xlu2 %645 }
  0xcb   : > { %v582_v18 = vmul.f32 %v578_v61, %v574_v17  ;;  %v583_v19 = vmul.f32 %v579_v62, %v573_v14 }
  0xcd   : > { %v584_v21 = vpack.c.bf16 %v583_v19, %v582_v18 }
  0xce   : > { %v929_v22 = vld.sshfl [vmem:[#allocation1 + $0x8] sm:$0xff pattern:$0x75316420]  ;;  %v928_v23 = vld.sshfl [vmem:[#allocation1] sm:$0xff pattern:$0x75316420] }
  0xcf   : > { %934 = vrot.lane.b32.xlu0 %v929_v22, %s2188_s11  ;;  %952 = vst [vmem:[#allocation1] ss:$2 sm:$0xff] %v2265_v0  ;;  %932 = vrot.lane.b32.xlu2 %v928_v23, %s2188_s11  ;;  %v586_v24 = vrot.slane %v584_v21, 6 }
  0xd1   : > { %588 = vst [vmem:[#allocation2 + $0x18] sm:$0xcc] %v586_v24  ;;  %v597_v28 = vpop.permute.xlu0 %596 }
  0xd2   : > { %v599_v29 = vsel %vm598_vm2, %v595_v20, %v597_v28  ;;  %v600_v30 = vsel %vm598_vm2, %v597_v28, %v595_v20 }
  0xd3   : > { %v608_v31 = vmul.f32 %v604_v26, %v600_v30  ;;  %v609_v32 = vmul.f32 %v605_v27, %v599_v29  ;;  %v2431_v30 = vpack.c.bf16 %v2270_v2, %v2268_v1 }
  0xd5   : > { %v610_v34 = vpack.c.bf16 %v609_v32, %v608_v31  ;;  %v710_v32 = vrot.slane %v2431_v30, 6 }
  0xd6   : > { %v953_v35 = vld.sshfl [vmem:[#allocation1] sm:$0xff pattern:$0x75316420]  ;;  %v954_v36 = vld.sshfl [vmem:[#allocation1 + $0x8] sm:$0xff pattern:$0x75316420] }
  0xd7   : > { %957 = vrot.lane.b32.xlu1 %v953_v35, %s2204_s26  ;;  %974 = vst [vmem:[#allocation1] ss:$2 sm:$0xff] %v2265_v0 }
  0xd8   : > { %611 = vst [vmem:[#allocation2 + $0x20] sm:$0x33] %v610_v34 }
  0xd9   : > { %v618_v40 = vpop.permute.xlu1 %617  ;;  %712 = vst [vmem:[#allocation2 + $0x30] sm:$0xcc] %v710_v32 }
  0xda   : > { %v622_v41 = vsel %vm2864_vm3, %v618_v40, %v620_v39  ;;  %v623_v42 = vsel %vm2864_vm3, %v620_v39, %v618_v40 }
  0xdb   : > { %v631_v43 = vmul.f32 %v627_v37, %v623_v42  ;;  %v632_v44 = vmul.f32 %v628_v38, %v622_v41 }
  0xdd   : > { %v633_v46 = vpack.c.bf16 %v632_v44, %v631_v43 }
  0xde   : > { %v975_v47 = vld.sshfl [vmem:[#allocation1] sm:$0xff pattern:$0x75316420]  ;;  %v976_v49 = vld.sshfl [vmem:[#allocation1 + $0x8] sm:$0xff pattern:$0x75316420] }
  0xdf   : > { %959 = vrot.lane.b32.xlu1 %v954_v36, %s2204_s26  ;;  %979 = vrot.lane.b32.xlu0 %v975_v47, %s2189_s12  ;;  %999 = vst [vmem:[#allocation1] ss:$2 sm:$0xff] %v2265_v0  ;;  %v635_v50 = vrot.slane %v633_v46, 6  ;;  %v1897_v0 = vld [vmem:[%s2850_s1 + $0x13] ss:$8 sm:$0x3] }
  0xe0   : > { %v676_v61 = vperm.slane %v1897_v0, 0  ;;  %v677_v62 = vperm.slane %v1897_v0, 1 }
  0xe1   : > { %637 = vst [vmem:[#allocation2 + $0x20] sm:$0xcc] %v635_v50  ;;  %v644_v53 = vpop.permute.xlu1 %643  ;;  %v719_v33 = vpop.permute.xlu2 %718 }
  0xe2   : > { %v648_v55 = vsel %vm647_vm4, %v644_v53, %v646_v54  ;;  %v649_v56 = vsel %vm647_vm4, %v646_v54, %v644_v53 }
  0xe3   : > { %v657_v57 = vmul.f32 %v653_v51, %v649_v56  ;;  %v658_v58 = vmul.f32 %v654_v52, %v648_v55  ;;  %v1902_v55 = vld [vmem:[%s2850_s1 + $0x21] ss:$8 sm:$0x3] }
  0xe5   : > { %v659_v59 = vpack.c.bf16 %v658_v58, %v657_v57  ;;  %v801_v57 = vperm.slane %v1902_v55, 1 }
  0xe6   : > { %v1000_v60 = vld.sshfl [vmem:[#allocation1] sm:$0xff pattern:$0x75316420]  ;;  %v1001_v20 = vld.sshfl [vmem:[#allocation1 + $0x8] sm:$0xff pattern:$0x75316420] }
  0xe7   : > { %496 = vrot.lane.b32.xlu1 %v2293_v11, %s2203_s30  ;;  %981 = vrot.lane.b32.xlu0 %v976_v49, %s2189_s12  ;;  %660 = vst [vmem:[#allocation2 + $0x28] sm:$0x33] %v659_v59  ;;  %v1898_v11 = vld [vmem:[%s2850_s1 + $0x14] ss:$8 sm:$0x3] }
  0xe8   : > { %1004 = vrot.lane.b32.xlu2 %v1000_v60, %s2190_s13  ;;  %v702_v23 = vperm.slane %v1898_v11, 0  ;;  %v703_v24 = vperm.slane %v1898_v11, 1 }
  0xe9   : > { %v667_v63 = vpop.permute.xlu0 %666  ;;  %v669_v13 = vpop.permute.xlu1 %668 }
  0xea   : > { %v671_v14 = vsel %vm670_vm5, %v667_v63, %v669_v13  ;;  %v672_v17 = vsel %vm670_vm5, %v669_v13, %v667_v63  ;;  %v744_v40 = vpop.permute.xlu2 %743 }
  0xeb   : > { %v680_v18 = vmul.f32 %v676_v61, %v672_v17  ;;  %v681_v19 = vmul.f32 %v677_v62, %v671_v14  ;;  %v1903_v62 = vld [vmem:[%s2850_s1 + $0x22] ss:$8 sm:$0x3] }
  0xec   : > { %v825_v17 = vperm.slane %v1903_v62, 0 }
  0xed   : > { %v682_v21 = vpack.c.bf16 %v681_v19, %v680_v18 }
  0xef   : > { %547 = vrot.lane.b32.xlu1 %v2303_v16, %s2204_s26  ;;  %545 = vrot.lane.b32.xlu0 %v2301_v15, %s2204_s26  ;;  %v684_v22 = vrot.slane %v682_v21, 6  ;;  %v1899_v15 = vld [vmem:[%s2850_s1 + $0x16] ss:$8 sm:$0x3] }
  0xf0   : > { %1006 = vrot.lane.b32.xlu2 %v1001_v20, %s2190_s13  ;;  %v728_v34 = vperm.slane %v1899_v15, 0  ;;  %v729_v35 = vperm.slane %v1899_v15, 1 }
  0xf1   : > { %686 = vst [vmem:[#allocation2 + $0x28] sm:$0xcc] %v684_v22  ;;  %v693_v25 = vpop.permute.xlu0 %692  ;;  %v695_v26 = vpop.permute.xlu1 %694  ;;  %v1904_v22 = vld [vmem:[%s2850_s1 + $0x23] ss:$8 sm:$0x3] }
  0xf2   : > { %v697_v27 = vsel %vm696_vm6, %v693_v25, %v695_v26  ;;  %v698_v28 = vsel %vm696_vm6, %v695_v26, %v693_v25  ;;  %v847_v25 = vperm.slane %v1904_v22, 0  ;;  %v848_v26 = vperm.slane %v1904_v22, 1  ;;  %v1909_v22 = vld [vmem:[%s2850_s1 + $0x30] ss:$8 sm:$0x3] }
  0xf3   : > { %v706_v16 = vmul.f32 %v702_v23, %v698_v28  ;;  %v707_v29 = vmul.f32 %v703_v24, %v697_v27 }
  0xf5   : > { %v708_v31 = vpack.c.bf16 %v707_v29, %v706_v16 }
  0xf7   : > { %470 = vrot.lane.b32.xlu1 %v2288_v9, %s2202_s25  ;;  %423 = vrot.lane.b32.xlu0 %v2280_v6, %s2200_s23  ;;  %709 = vst [vmem:[#allocation2 + $0x30] sm:$0x33] %v708_v31  ;;  %v1900_v6 = vld [vmem:[%s2850_s1 + $0x17] ss:$8 sm:$0x3] }
  0xf8   : > { %498 = vrot.lane.b32.xlu2 %v2295_v12, %s2203_s30  ;;  %v751_v12 = vperm.slane %v1900_v6, 0  ;;  %v752_v39 = vperm.slane %v1900_v6, 1  ;;  %v1905_v31 = vld [vmem:[%s2850_s1 + $0x24] ss:$8 sm:$0x3] }
  0xf9   : > { %v721_v1 = vpop.permute.xlu0 %720  ;;  %v791_v53 = vpop.permute.xlu2 %790 }
  0xfa   : > { %v723_v2 = vsel %vm722_vm7, %v719_v33, %v721_v1  ;;  %v724_v9 = vsel %vm722_vm7, %v721_v1, %v719_v33 }
  0xfb   : > { %v732_v36 = vmul.f32 %v728_v34, %v723_v2  ;;  %v733_v37 = vmul.f32 %v729_v35, %v724_v9  ;;  %v872_v34 = vperm.slane %v1905_v31, 0  ;;  %v873_v35 = vperm.slane %v1905_v31, 1 }
  0xfd   : > { %v734_v38 = vpack.c.bf16 %v733_v37, %v732_v36 }
  0xff   : > { %399 = vrot.lane.b32.xlu1 %v2275_v4, %s2199_s22  ;;  %397 = vrot.lane.b32.xlu0 %v2273_v3, %s2199_s22  ;;  %735 = vst [vmem:[#allocation2 + $0x38] sm:$0x33] %v734_v38  ;;  %v1901_v3 = vld [vmem:[%s2850_s1 + $0x20] ss:$8 sm:$0x3] }
 0x100   : > { %421 = vrot.lane.b32.xlu2 %v2278_v5, %s2200_s23  ;;  %v777_v5 = vperm.slane %v1901_v3, 0  ;;  %v778_v47 = vperm.slane %v1901_v3, 1  ;;  %v1906_v38 = vld [vmem:[%s2850_s1 + $0x25] ss:$8 sm:$0x3] }
 0x101   : > { %v742_v41 = vpop.permute.xlu1 %741  ;;  %v817_v63 = vpop.permute.xlu2 %816 }
 0x102   : > { %v746_v42 = vsel %vm745_vm8, %v742_v41, %v744_v40  ;;  %v747_v43 = vsel %vm745_vm8, %v744_v40, %v742_v41  ;;  %v895_v40 = vperm.slane %v1906_v38, 1 }
 0x103   : > { %v755_v4 = vmul.f32 %v751_v12, %v746_v42  ;;  %v756_v44 = vmul.f32 %v752_v39, %v747_v43  ;;  %v894_v39 = vperm.slane %v1906_v38, 0 }
 0x105   : > { %v757_v45 = vpack.c.bf16 %v756_v44, %v755_v4 }
 0x107   : > { %449 = vrot.lane.b32.xlu0 %v2285_v8, %s2201_s24  ;;  %v759_v46 = vrot.slane %v757_v45, 6  ;;  %v1907_v45 = vld [vmem:[%s2850_s1 + $0x26] ss:$8 sm:$0x3] }
 0x108   : > { %472 = vrot.lane.b32.xlu2 %v2290_v10, %s2202_s25  ;;  %v800_v10 = vperm.slane %v1902_v55, 0 }
 0x109   : > { %761 = vst [vmem:[#allocation2 + $0x38] sm:$0xcc] %v759_v46  ;;  %v768_v49 = vpop.permute.xlu0 %767  ;;  %v770_v50 = vpop.permute.xlu1 %769 }
 0x10a   : > { %v772_v51 = vsel %vm2861_vm9, %v768_v49, %v770_v50  ;;  %v773_v52 = vsel %vm2861_vm9, %v770_v50, %v768_v49  ;;  %v841_v24 = vpop.permute.xlu2 %840  ;;  %v920_v49 = vperm.slane %v1907_v45, 1  ;;  %vm1114_vm9 = vcmask 1045504  }
 0x10b   : > { %v781_v54 = vmul.f32 %v777_v5, %v772_v51  ;;  %v782_v8 = vmul.f32 %v778_v47, %v773_v52  ;;  %v919_v47 = vperm.slane %v1907_v45, 0 }
 0x10d   : > { %v783_v56 = vpack.c.bf16 %v782_v8, %v781_v54 }
 0x10f   : > { %784 = vst [vmem:[#allocation2 + $0x40] sm:$0x33] %v783_v56  ;;  %v1908_v56 = vld [vmem:[%s2850_s1 + $0x27] ss:$8 sm:$0x3] }
 0x110   : > { %447 = vrot.lane.b32.xlu2 %v2283_v7, %s2201_s24  ;;  %v826_v7 = vperm.slane %v1903_v62, 1 }
 0x111   : > { %v793_v58 = vpop.permute.xlu0 %792 }
 0x112   : > { %v795_v0 = vsel %vm2860_vm10, %v791_v53, %v793_v58  ;;  %v796_v59 = vsel %vm2860_vm10, %v793_v58, %v791_v53  ;;  %v866_v1 = vpop.permute.xlu2 %865  ;;  %v942_v58 = vperm.slane %v1908_v56, 1  ;;  %vm549_vm10 = vcmp.lt.s32.totalorder %v2351_v48, 57 }
 0x113   : > { %v804_v60 = vmul.f32 %v800_v10, %v795_v0  ;;  %v805_v61 = vmul.f32 %v801_v57, %v796_v59  ;;  %v941_v57 = vperm.slane %v1908_v56, 0  ;;  %v1887_v56 = vld [vmem:[%s2850_s1 + $0x1] ss:$8 sm:$0x3] }
 0x115   : > { %v806_v13 = vpack.c.bf16 %v805_v61, %v804_v60 }
 0x117   : > { %v808_v14 = vrot.slane %v806_v13, 6 }
 0x119   : > { %810 = vst [vmem:[#allocation2 + $0x40] sm:$0xcc] %v808_v14  ;;  %v819_v18 = vpop.permute.xlu0 %818  ;;  %v1911_v14 = vld [vmem:[%s2850_s1 + $0x32] ss:$8 sm:$0x3] }
 0x11a   : > { %v820_v19 = vsel %vm2862_vm11, %v817_v63, %v819_v18  ;;  %v821_v11 = vsel %vm2862_vm11, %v819_v18, %v817_v63  ;;  %v1014_v18 = vperm.slane %v1911_v14, 1 }
 0x11b   : > { %v829_v20 = vmul.f32 %v825_v17, %v820_v19  ;;  %v830_v21 = vmul.f32 %v826_v7, %v821_v11  ;;  %v1013_v7 = vperm.slane %v1911_v14, 0 }
 0x11d   : > { %v831_v23 = vpack.c.bf16 %v830_v21, %v829_v20 }
 0x11f   : > { %832 = vst [vmem:[#allocation2 + $0x48] sm:$0x33] %v831_v23 }
 0x121   : > { %v839_v27 = vpop.permute.xlu1 %838 }
 0x122   : > { %v842_v28 = vsel %vm425_vm12, %v839_v27, %v841_v24  ;;  %v843_v16 = vsel %vm425_vm12, %v841_v24, %v839_v27  ;;  %v967_v27 = vperm.slane %v1909_v22, 1 }
 0x123   : > { %v851_v29 = vmul.f32 %v847_v25, %v842_v28  ;;  %v852_v15 = vmul.f32 %v848_v26, %v843_v16  ;;  %v966_v26 = vperm.slane %v1909_v22, 0 }
 0x125   : > { %v853_v32 = vpack.c.bf16 %v852_v15, %v851_v29 }
 0x127   : > { %v855_v33 = vrot.slane %v853_v32, 6 }
 0x129   : > { %857 = vst [vmem:[#allocation2 + $0x48] sm:$0xcc] %v855_v33  ;;  %v864_v2 = vpop.permute.xlu1 %863  ;;  %v933_v50 = vpop.permute.xlu2 %932  ;;  %v1910_v33 = vld [vmem:[%s2850_s1 + $0x31] ss:$8 sm:$0x3] }
 0x12a   : > { %v867_v9 = vsel %vm451_vm13, %v864_v2, %v866_v1  ;;  %v868_v36 = vsel %vm451_vm13, %v866_v1, %v864_v2  ;;  %v988_v2 = vperm.slane %v1910_v33, 0 }
 0x12b   : > { %v876_v37 = vmul.f32 %v872_v34, %v867_v9  ;;  %v877_v6 = vmul.f32 %v873_v35, %v868_v36  ;;  %v1890_v34 = vld [vmem:[%s2850_s1 + $0x4] ss:$8 sm:$0x3]  ;;  %v989_v9 = vperm.slane %v1910_v33, 1 }
 0x12c   : > { %v506_v36 = vperm.slane %v1890_v34, 0 }
 0x12d   : > { %v878_v12 = vpack.c.bf16 %v877_v6, %v876_v37  ;;  %v507_v37 = vperm.slane %v1890_v34, 1 }
 0x12f   : > { %879 = vst [vmem:[#allocation2 + $0x50] sm:$0x33] %v878_v12 }
 0x131   : > { %v886_v41 = vpop.permute.xlu0 %885  ;;  %v888_v42 = vpop.permute.xlu1 %887 }
 0x132   : > { %v889_v43 = vsel %vm2863_vm14, %v886_v41, %v888_v42  ;;  %v890_v4 = vsel %vm2863_vm14, %v888_v42, %v886_v41 }
 0x133   : > { %v898_v44 = vmul.f32 %v894_v39, %v889_v43  ;;  %v899_v3 = vmul.f32 %v895_v40, %v890_v4 }
 0x135   : > { %v900_v46 = vpack.c.bf16 %v899_v3, %v898_v44  ;;  %v1892_v3 = vld [vmem:[%s2850_s1 + $0x6] ss:$8 sm:$0x3] }
 0x137   : > { %v902_v5 = vrot.slane %v900_v46, 6 }
 0x139   : > { %904 = vst [vmem:[#allocation2 + $0x50] sm:$0xcc] %v902_v5  ;;  %v911_v51 = vpop.permute.xlu0 %910  ;;  %v913_v52 = vpop.permute.xlu1 %912 }
 0x13a   : > { %v914_v53 = vsel %vm500_vm15, %v911_v51, %v913_v52  ;;  %v915_v54 = vsel %vm500_vm15, %v913_v52, %v911_v51 }
 0x13b   : > { %v923_v8 = vmul.f32 %v919_v47, %v914_v53  ;;  %v924_v55 = vmul.f32 %v920_v49, %v915_v54  ;;  %v555_v49 = vperm.slane %v1892_v3, 0 }
 0x13d   : > { %v925_v10 = vpack.c.bf16 %v924_v55, %v923_v8 }
 0x13f   : > { %926 = vst [vmem:[#allocation2 + $0x58] sm:$0x33] %v925_v10  ;;  %v1889_v10 = vld [vmem:[%s2850_s1 + $0x3] ss:$8 sm:$0x3] }
 0x140   : > { %v1954_v33 = vld [vmem:[#allocation2 + $0x50] sm:$0xf]  ;;  %v2115_v34 = vld [vmem:[#allocation2 + $0x54] sm:$0xf] }
 0x141   : > { %v935_v0 = vpop.permute.xlu0 %934 }
 0x142   : > { %v936_v59 = vsel %vm2865_vm0, %v933_v50, %v935_v0  ;;  %v937_v60 = vsel %vm2865_vm0, %v935_v0, %v933_v50  ;;  %v1005_v61 = vpop.permute.xlu2 %1004  ;;  %v556_v50 = vperm.slane %v1892_v3, 1  ;;  %v432_v0 = vperm.slane %v1887_v56, 1 }
 0x143   : > { %v945_v62 = vmul.f32 %v941_v57, %v936_v59  ;;  %v946_v63 = vmul.f32 %v942_v58, %v937_v60  ;;  %v431_v58 = vperm.slane %v1887_v56, 0  ;;  %v480_v60 = vperm.slane %v1889_v10, 0  ;;  %v2110_v56 = vld [vmem:[#allocation2 + $0x24] sm:$0xf0] }
 0x145   : > { %v947_v13 = vpack.c.bf16 %v946_v63, %v945_v62 }
 0x147   : > { %v949_v17 = vrot.slane %v947_v13, 6 }
 0x149   : > { %951 = vst [vmem:[#allocation2 + $0x58] sm:$0xcc] %v949_v17  ;;  %v958_v19 = vpop.permute.xlu1 %957 }
 0x14a   : > { %v1007_v11 = vpop.permute.xlu2 %1006 }
 0x14b   : > { %v1008_v20 = vsel %vm598_vm2, %v1005_v61, %v1007_v11  ;;  %v1009_v21 = vsel %vm598_vm2, %v1007_v11, %v1005_v61  ;;  %v481_v61 = vperm.slane %v1889_v10, 1  ;;  %v2109_v10 = vld [vmem:[#allocation2 + $0x24] sm:$0xf] }
 0x14c   : > { %v1017_v23 = vmul.f32 %v1013_v7, %v1008_v20  ;;  %v1018_v24 = vmul.f32 %v1014_v18, %v1009_v21 }
 0x14e   : > { %v1019_v25 = vpack.c.bf16 %v1018_v24, %v1017_v23 }
 0x150   : > { %1020 = vst [vmem:[#allocation2 + $0x68] sm:$0x33] %v1019_v25 }
 0x151   : > { %v960_v28 = vpop.permute.xlu1 %959  ;;  %v980_v16 = vpop.permute.xlu0 %979 }
 0x152   : > { %v961_v29 = vsel %vm549_vm10, %v958_v19, %v960_v28  ;;  %v962_v15 = vsel %vm549_vm10, %v960_v28, %v958_v19  ;;  %v499_v1 = vpop.permute.xlu2 %498  ;;  %v1956_v28 = vld [vmem:[#allocation2 + $0x58] sm:$0xf0] }
 0x153   : > { %v970_v31 = vmul.f32 %v966_v26, %v961_v29  ;;  %v971_v32 = vmul.f32 %v967_v27, %v962_v15  ;;  %v2116_v27 = vld [vmem:[#allocation2 + $0x54] sm:$0xf0] }
 0x155   : > { %v972_v35 = vpack.c.bf16 %v971_v32, %v970_v31  ;;  %v1036_v31 = vld [vmem:[%s2852_s3] sm:$0xff] }
 0x157   : > { %973 = vst [vmem:[#allocation2 + $0x60] sm:$0x33] %v972_v35  ;;  %v2118_v59 = vld [vmem:[#allocation2 + $0x64] sm:$0x30]  ;;  %v1964_v14 = vld [vmem:[#allocation2 + $0x68] sm:$0x30] }
 0x158   : > { %v2205_v35 = vmov 0  }
 0x159   : > { %v497_v6 = vpop.permute.xlu1 %496  ;;  %v982_v38 = vpop.permute.xlu0 %981  ;;  %2171 = vset.pattern.permute.xlu1 %v2205_v35  ;;  %2173 = vset.pattern.permute.xlu0 %v2205_v35 }
 0x15a   : > { %v983_v12 = vsel %vm572_vm1, %v980_v16, %v982_v38  ;;  %v984_v39 = vsel %vm572_vm1, %v982_v38, %v980_v16  ;;  %v501_v40 = vsel %vm500_vm15, %v497_v6, %v499_v1  ;;  %v502_v41 = vsel %vm500_vm15, %v499_v1, %v497_v6  ;;  %v422_v5 = vpop.permute.xlu2 %421  ;;  %v406_v16 = vld [vmem:[%s2850_s1] ss:$8 sm:$0x3]  ;;  %1039 = vperm.xlu1 %2171, %v1036_v31  }
 0x15b   : > { %v992_v42 = vmul.f32 %v988_v2, %v983_v12  ;;  %v993_v43 = vmul.f32 %v989_v9, %v984_v39  ;;  %v510_v4 = vmul.f32 %v506_v36, %v502_v41  ;;  %v511_v44 = vmul.f32 %v507_v37, %v501_v40  ;;  %v2114_v36 = vld [vmem:[#allocation2 + $0x44] sm:$0xf0]  ;;  %2172 = vset.pattern.permute.xlu2 %v2205_v35  ;;  %v1948_v12 = vld [vmem:[#allocation2 + $0x48] sm:$0xf0] }
 0x15c   : > { %v1955_v1 = vor.u32 %v2116_v27, %v1954_v33  ;;  %v1959_v2 = vor.u32 %v2115_v34, %v1956_v28  ;;  %v408_v6 = vperm.slane %v406_v16, 0  ;;  %v409_v38 = vperm.slane %v406_v16, 1  ;;  %v1021_v16 = vld [vmem:[%s2851_s2] sm:$0xf] }
 0x15d   : > { %v994_v45 = vpack.c.bf16 %v993_v43, %v992_v42  ;;  %v512_v46 = vpack.c.bf16 %v511_v44, %v510_v4  ;;  %v1946_v42 = vld [vmem:[#allocation2 + $0x40] sm:$0xf]  ;;  %v2113_v43 = vld [vmem:[#allocation2 + $0x44] sm:$0xf] }
 0x15e   : > { %v1947_v3 = vor.u32 %v2114_v36, %v1946_v42 }
 0x15f   : > { %v996_v47 = vrot.slane %v994_v45, 6  ;;  %513 = vst [vmem:[#allocation2 + $0x10] sm:$0x33] %v512_v46  ;;  %v1951_v45 = vor.u32 %v2113_v43, %v1948_v12  ;;  %v1938_v46 = vld [vmem:[#allocation2 + $0x30] sm:$0xf] }
 0x161   : > { %998 = vst [vmem:[#allocation2 + $0x60] sm:$0xcc] %v996_v47  ;;  %v548_v51 = vpop.permute.xlu1 %547  ;;  %v546_v52 = vpop.permute.xlu0 %545 }
 0x162   : > { %v550_v53 = vsel %vm549_vm10, %v546_v52, %v548_v51  ;;  %v551_v54 = vsel %vm549_vm10, %v548_v51, %v546_v52  ;;  %v473_v62 = vpop.permute.xlu2 %472  ;;  %v1940_v51 = vld [vmem:[#allocation2 + $0x38] sm:$0xf0]  ;;  %v1888_v52 = vld [vmem:[%s2850_s1 + $0x2] ss:$8 sm:$0x3] }
 0x163   : > { %v559_v8 = vmul.f32 %v555_v49, %v551_v54  ;;  %v560_v55 = vmul.f32 %v556_v50, %v550_v53  ;;  %v2112_v49 = vld [vmem:[#allocation2 + $0x34] sm:$0xf0]  ;;  %v2111_v50 = vld [vmem:[#allocation2 + $0x34] sm:$0xf] }
 0x164   : > { %v1939_v54 = vor.u32 %v2112_v49, %v1938_v46 }
 0x165   : > { %v561_v57 = vpack.c.bf16 %v560_v55, %v559_v8  ;;  %v1943_v8 = vor.u32 %v2111_v50, %v1940_v51  ;;  %v1930_v55 = vld [vmem:[#allocation2 + $0x20] sm:$0xf] }
 0x167   : > { %562 = vst [vmem:[#allocation2 + $0x18] sm:$0x33] %v561_v57  ;;  %v457_v57 = vperm.slane %v1888_v52, 0 }
 0x168   : > { %v1962_v63 = vld [vmem:[#allocation2 + $0x60] sm:$0xf]  ;;  %v2117_v13 = vld [vmem:[#allocation2 + $0x64] sm:$0xf] }
 0x169   : > { %v471_v17 = vpop.permute.xlu1 %470  ;;  %v424_v7 = vpop.permute.xlu0 %423  ;;  %v1963_v18 = vor.u32 %v2118_v59, %v1962_v63  ;;  %v1967_v19 = vor.u32 %v2117_v13, %v1964_v14  ;;  %v1932_v59 = vld [vmem:[#allocation2 + $0x28] sm:$0xf0]  ;;  %v1931_v63 = vor.u32 %v2110_v56, %v1930_v55  ;;  %v323_v56 = vunpack.c.l.b16 %v2431_v30 }
 0x16a   : > { %v426_v11 = vsel %vm425_vm12, %v422_v5, %v424_v7  ;;  %v427_v20 = vsel %vm425_vm12, %v424_v7, %v422_v5  ;;  %v475_v21 = vsel %vm2863_vm14, %v471_v17, %v473_v62  ;;  %v476_v22 = vsel %vm2863_vm14, %v473_v62, %v471_v17 }
 0x16b   : > { %v435_v23 = vmul.f32 %v431_v58, %v427_v20  ;;  %v436_v24 = vmul.f32 %v432_v0, %v426_v11  ;;  %v1116_v25 = vsel %vm1114_vm9, %v1963_v18, 0  ;;  %v1119_v26 = vsel %vm1114_vm9, %v1967_v19, 0  ;;  %v448_v0 = vpop.permute.xlu2 %447  ;;  %v1922_v11 = vld [vmem:[#allocation2 + $0x10] sm:$0xf]  ;;  %v2107_v20 = vld [vmem:[#allocation2 + $0x14] sm:$0xf] }
 0x16c   : > { %1122 = vmatpush.bf16.msra.mxu2 %v1116_v25  ;;  %1135 = vmatpush.bf16.msra.mxu3 %v1119_v26  ;;  %v484_v29 = vmul.f32 %v480_v60, %v476_v22  ;;  %v485_v15 = vmul.f32 %v481_v61, %v475_v21  ;;  %v458_v58 = vperm.slane %v1888_v52, 1  ;;  %v1935_v13 = vor.u32 %v2109_v10, %v1932_v59 }
 0x16d   : > { %v437_v32 = vpack.c.bf16 %v436_v24, %v435_v23  ;;  %vm1110_vm9 = vcmask 883712   ;;  %v324_v10 = vunpack.c.h.b16 %v2431_v30  ;;  %v316_v30 = vld [vmem:[%s2856_s7] sm:$0xff] }
 0x16e   : > { %v486_v9 = vpack.c.bf16 %v485_v15, %v484_v29  ;;  %v2108_v7 = vld [vmem:[#allocation2 + $0x14] sm:$0xf0]  ;;  %v1924_v18 = vld [vmem:[#allocation2 + $0x18] sm:$0xf0] }
 0x16f   : > { %v439_v37 = vrot.slane %v437_v32, 6  ;;  %v1923_v21 = vor.u32 %v2108_v7, %v1922_v11  ;;  %v1927_v22 = vor.u32 %v2107_v20, %v1924_v18  ;;  %v1982_v7 = vld [vmem:[%s2850_s1 + $0x16] ss:$8 sm:$0x3] }
 0x170   : > { %1123 = vmatpush.bf16.msra.mxu2 %v1955_v1  ;;  %1136 = vmatpush.bf16.msra.mxu3 %v1959_v2  ;;  %v488_v39 = vrot.slane %v486_v9, 6 }
 0x171   : > { %441 = vst [vmem:[#allocation2] sm:$0xcc] %v439_v37  ;;  %v400_v40 = vpop.permute.xlu1 %399  ;;  %v398_v41 = vpop.permute.xlu0 %397 }
 0x172   : > { %v404_v4 = vsel %vm2862_vm11, %v398_v41, %v400_v40  ;;  %v405_v44 = vsel %vm2862_vm11, %v400_v40, %v398_v41  ;;  %490 = vst [vmem:[#allocation2 + $0x8] sm:$0xcc] %v488_v39 }
 0x173   : > { %v412_v5 = vmul.f32 %v408_v6, %v405_v44  ;;  %v413_v47 = vmul.f32 %v409_v38, %v404_v4 }
 0x174   : > { %1124 = vmatpush.bf16.msra.mxu2 %v1947_v3  ;;  %1137 = vmatpush.bf16.msra.mxu3 %v1951_v45 }
 0x175   : > { %v414_v53 = vpack.c.bf16 %v413_v47, %v412_v5 }
 0x177   : > { %415 = vst [vmem:[#allocation2] sm:$0x33] %v414_v53 }
 0x178   : > { %1125 = vmatpush.bf16.msra.mxu2 %v1939_v54  ;;  %1138 = vmatpush.bf16.msra.mxu3 %v1943_v8 }
 0x179   : > { %v450_v60 = vpop.permute.xlu0 %449 }
 0x17a   : > { %v452_v61 = vsel %vm451_vm13, %v448_v0, %v450_v60  ;;  %v453_v62 = vsel %vm451_vm13, %v450_v60, %v448_v0  ;;  %v315_v60 = vld [vmem:[%s2855_s6] sm:$0xf] }
 0x17b   : > { %v461_v14 = vmul.f32 %v457_v57, %v453_v62  ;;  %v462_v17 = vmul.f32 %v458_v58, %v452_v61  ;;  %v325_v57 = vpack.c.b16 %v323_v56, %v323_v56  ;;  %v326_v58 = vpack.c.b16 %v324_v10, %v324_v10  ;;  %v1977_v10 = vld [vmem:[%s2850_s1 + $0x10] ss:$8 sm:$0x3] }
 0x17c   : > { %1126 = vmatpush.bf16.msra.mxu2 %v1931_v63  ;;  %1139 = vmatpush.bf16.msra.mxu3 %v1935_v13 }
 0x17d   : > { %v463_v19 = vpack.c.bf16 %v462_v17, %v461_v14  ;;  %v1976_v14 = vld [vmem:[%s2850_s1 + $0x7] ss:$8 sm:$0x3]  ;;  %v1993_v17 = vld [vmem:[%s2850_s1 + $0x31] ss:$8 sm:$0x3] }
 0x17e   : > { %v1914_v23 = vld [vmem:[#allocation2] sm:$0xf]  ;;  %v2105_v25 = vld [vmem:[#allocation2 + $0x4] sm:$0xf]  ;;  %v1302_v11 = vperm.slane %v1976_v14, 1  ;;  %v1527_v20 = vperm.slane %v1993_v17, 0 }
 0x17f   : > { %464 = vst [vmem:[#allocation2 + $0x8] sm:$0x33] %v463_v19  ;;  %v1301_v19 = vperm.slane %v1976_v14, 0 }
 0x180   : > { %1127 = vmatpush.bf16.msra.mxu2 %v1923_v21  ;;  %1140 = vmatpush.bf16.msra.mxu3 %v1927_v22  ;;  %v1528_v21 = vperm.slane %v1993_v17, 1 }
 0x186   : > { %v2106_v24 = vld [vmem:[#allocation2 + $0x4] sm:$0xf0]  ;;  %v1916_v26 = vld [vmem:[#allocation2 + $0x8] sm:$0xf0] }
 0x187   : > { %v1915_v27 = vor.u32 %v2106_v24, %v1914_v23  ;;  %v1919_v28 = vor.u32 %v2105_v25, %v1916_v26  ;;  %v1399_v23 = vperm.slane %v1982_v7, 0  ;;  %v1400_v24 = vperm.slane %v1982_v7, 1  ;;  %v1971_v7 = vld [vmem:[%s2850_s1 + $0x2] ss:$8 sm:$0x3] }
 0x189   : > { %1128 = vmatpush.bf16.msra.mxu2 %v1915_v27  ;;  %1141 = vmatpush.bf16.msra.mxu3 %v1919_v28 }
 0x18c   : > { %1968 = vmatmul.msk.bf16.vlgmr.msra.gmra.mxu2 %vm1110_vm9, %v1021_v16  ;;  %1969 = vmatmul.msk.bf16.vlgmr.msra.gmra.mxu3 %vm1110_vm9, %v1021_v16 }
 0x1cc   : > { %v1040_v29 = vpop.permute.xlu1 %1039 }
 0x20f   : > { %v1130_v15 = vpop.f32.mrf.mxu2  ;;  %v1143_v31 = vpop.f32.mrf.mxu3 }
 0x210   : > { %v1131_v32 = vadd.f32 %v1130_v15, %v1040_v29  ;;  %v1144_v33 = vadd.f32 %v1143_v31, %v1040_v29 }
 0x212   : > { %v1147_v34 = vadd.f32 %v1144_v33, %v1131_v32  ;;  %v1151_v35 = vmul.f32 %v1131_v32, %v1131_v32  ;;  %v1152_v1 = vmul.f32 %v1144_v33, %v1144_v33 }
 0x214   : > { %1148 = vadd.xlane.f32.xlu2 %v1147_v34  ;;  %v1153_v2 = vadd.f32 %v1152_v1, %v1151_v35 }
 0x216   : > { %1154 = vadd.xlane.f32.xlu0 %v1153_v2 }
 0x217   : > { %v1132_v9 = vpop.f32.mrf.mxu2  ;;  %v1145_v36 = vpop.f32.mrf.mxu3 }
 0x287   : > { %v1149_v37 = vpop.xlane.xlu2 %1148 }
 0x288   : > { %v1150_v6 = vmul.f32 0.00390625, %v1149_v37 }
 0x289   : > { %v1155_v38 = vpop.xlane.xlu0 %1154 }
 0x28a   : > { %v1156_v12 = vmul.f32 0.00390625, %v1155_v38  ;;  %v1157_v39 = vmul.f32 %v1150_v6, %v1150_v6  ;;  %v1160_v5 = vsub.f32 %v1131_v32, %v1150_v6  ;;  %v1161_v47 = vsub.f32 %v1144_v33, %v1150_v6  ;;  %v1973_v6 = vld [vmem:[%s2850_s1 + $0x4] ss:$8 sm:$0x3] }
 0x28b   : > { %v1990_v38 = vld [vmem:[%s2850_s1 + $0x26] ss:$8 sm:$0x3] }
 0x28c   : > { %v1158_v40 = vsub.f32 %v1156_v12, %v1157_v39  ;;  %v1983_v12 = vld [vmem:[%s2850_s1 + $0x17] ss:$8 sm:$0x3]  ;;  %v1253_v39 = vperm.slane %v1973_v6, 0 }
 0x28e   : > { %v1159_v41 = vmax.f32 %v1158_v40, 0.0  ;;  %v1254_v40 = vperm.slane %v1973_v6, 1 }
 0x290   : > { %v1162_v42 = vadd.f32 1e-05, %v1159_v41  ;;  %v1497_v41 = vperm.slane %v1990_v38, 0 }
 0x292   : > { %2174 = vrsqrt.f32 %v1162_v42  ;;  %vm1169_vm11 = vweird.f32 %v1162_v42 }
 0x298   : > { %v2175_v43 = vpop.eup %2174 }
 0x299   : > { %v1164_v4 = vmul.f32 %v2175_v43, %v1162_v42  ;;  %vm1170_vm9 = vweird.f32 %v2175_v43  ;;  %v1498_v42 = vperm.slane %v1990_v38, 1 }
 0x29a   : > { %vm1171_vm14 = vmor %vm1169_vm11, %vm1170_vm9  ;;  %vm1720_vm9 = vcmask 719872  }
 0x29b   : > { %v1165_v44 = vmul.f32 %v2175_v43, %v1164_v4  ;;  %v1415_v4 = vperm.slane %v1983_v12, 0 }
 0x29d   : > { %v1166_v3 = vmul.f32 0.5, %v1165_v44  ;;  %v1416_v44 = vperm.slane %v1983_v12, 1 }
 0x29f   : > { %v1167_v45 = vsub.f32 1.5, %v1166_v3 }
 0x2a1   : > { %v1168_v46 = vmul.f32 %v2175_v43, %v1167_v45 }
 0x2a3   : > { %v1172_v49 = vsel %vm1171_vm14, %v2175_v43, %v1168_v46  ;;  %vm2877_vm14 = vcmp.lt.s32.totalorder %v2351_v48, 119 }
 0x2a4   : > { %v1173_v50 = vmul.f32 %v1172_v49, %v1160_v5  ;;  %v1174_v51 = vmul.f32 %v1172_v49, %v1161_v47 }
 0x2a6   : > { %vm1175_vm3 = vcmp.gt.f32.partialorder %v1173_v50, 0.0  ;;  %vm1176_vm0 = vcmp.gt.f32.partialorder %v1174_v51, 0.0  ;;  %v1177_v52 = vmul.f32 0.01, %v1173_v50  ;;  %v1178_v53 = vmul.f32 0.01, %v1174_v51 }
 0x2a8   : > { %v1179_v54 = vsel %vm1175_vm3, %v1173_v50, %v1177_v52  ;;  %v1180_v8 = vsel %vm1176_vm0, %v1174_v51, %v1178_v53  ;;  %vm331_vm0 = vcmask 1041408   ;;  %vm327_vm3 = vcmask 31744  }
 0x2a9   : > { %1375 = vrot.lane.b32.xlu0 %v1180_v8, %s2194_s17  ;;  %1311 = vrot.lane.b32.xlu2 %v1180_v8, %s2190_s13  ;;  %v1389_v55 = vpack.c.bf16 %v1180_v8, %v1179_v54  ;;  %v333_v0 = vsel %vm331_vm0, %v325_v57, 0  ;;  %v336_v59 = vsel %vm331_vm0, %v326_v58, 0  ;;  %v1994_v57 = vld [vmem:[%s2850_s1 + $0x32] ss:$8 sm:$0x3] }
 0x2aa   : > { %1391 = vrot.lane.b32.xlu1 %v1179_v54, %s2195_s18  ;;  %345 = vmatpush.bf16.msra.mxu0 %v333_v0  ;;  %v1317_v0 = vperm.slane %v1977_v10, 0 }
 0x2ab   : > { %1390 = vst [vmem:[#allocation2 + $0x68] sm:$0xff] %v1389_v55  ;;  %358 = vmatpush.bf16.msra.mxu1 %v336_v59  ;;  %v1318_v59 = vperm.slane %v1977_v10, 1  ;;  %v1975_v10 = vld [vmem:[%s2850_s1 + $0x6] ss:$8 sm:$0x3] }
 0x2ad   : > { %1885 = vmatmul.msk.bf16.vlgmr.msra.gmra.mxu0 %vm327_vm3, %v315_v60 }
 0x2ae   : > { %1886 = vmatmul.msk.bf16.vlgmr.msra.gmra.mxu1 %vm327_vm3, %v315_v60  ;;  %v1537_v60 = vperm.slane %v1994_v57, 0 }
 0x2b1   : > { %1295 = vrot.lane.b32.xlu0 %v1180_v8, %s2189_s12  ;;  %1293 = vrot.lane.b32.xlu2 %v1179_v54, %s2189_s12  ;;  %s2866_s12 = smov 120  }
 0x2b2   : > { %1393 = vrot.lane.b32.xlu1 %v1180_v8, %s2195_s18 }
 0x2b9   : > { %1357 = vrot.lane.b32.xlu0 %v1179_v54, %s2193_s16  ;;  %1343 = vrot.lane.b32.xlu2 %v1180_v8, %s2192_s15 }
 0x2ba   : > { %1407 = vrot.lane.b32.xlu1 %v1179_v54, %s2196_s19 }
 0x2c1   : > { %1247 = vrot.lane.b32.xlu0 %v1180_v8, %s2203_s30  ;;  %1245 = vrot.lane.b32.xlu2 %v1179_v54, %s2203_s30 }
 0x2c2   : > { %1409 = vrot.lane.b32.xlu1 %v1180_v8, %s2196_s19 }
 0x2c9   : > { %1325 = vrot.lane.b32.xlu0 %v1179_v54, %s2191_s14  ;;  %1263 = vrot.lane.b32.xlu2 %v1180_v8, %s2188_s11 }
 0x2ca   : > { %1309 = vrot.lane.b32.xlu1 %v1179_v54, %s2190_s13  ;;  %s2104_s13 = sshll.u32 %s2880_s28, 4 }
 0x2cb   : > { %s305_s19 = scalar_lea.vmem %s2857_s8, %s2104_s13 }
 0x2d1   : > { %1215 = vrot.lane.b32.xlu0 %v1180_v8, %s2201_s24  ;;  %1213 = vrot.lane.b32.xlu2 %v1179_v54, %s2201_s24 }
 0x2d2   : > { %1373 = vrot.lane.b32.xlu1 %v1179_v54, %s2194_s17 }
 0x2d9   : > { %1181 = vrot.lane.b32.xlu0 %v1179_v54, %s2199_s22  ;;  %1231 = vrot.lane.b32.xlu2 %v1180_v8, %s2202_s25 }
 0x2da   : > { %1277 = vrot.lane.b32.xlu1 %v1179_v54, %s2204_s26 }
 0x2e1   : > { %1199 = vrot.lane.b32.xlu0 %v1180_v8, %s2200_s23  ;;  %1197 = vrot.lane.b32.xlu2 %v1179_v54, %s2200_s23 }
 0x2e2   : > { %1279 = vrot.lane.b32.xlu1 %v1180_v8, %s2204_s26 }
 0x2e9   : > { %1439 = vrot.lane.b32.xlu0 %v1179_v54, %s2198_s21  ;;  %1425 = vrot.lane.b32.xlu2 %v1180_v8, %s2866_s12 }
 0x2ea   : > { %1341 = vrot.lane.b32.xlu1 %v1179_v54, %s2192_s15 }
 0x2f1   : > { %319 = vperm.xlu0 %2173, %v316_v30   ;;  %v1538_v30 = vperm.slane %v1994_v57, 1  ;;  %v2132_v57 = vld [vmem:[#allocation2 + $0x64] sm:$0xf0] }
 0x2f2   : > { %1359 = vrot.lane.b32.xlu1 %v1180_v8, %s2193_s16 }
 0x2fa   : > { %1261 = vrot.lane.b32.xlu1 %v1179_v54, %s2188_s11 }
 0x302   : > { %1327 = vrot.lane.b32.xlu1 %v1180_v8, %s2191_s14 }
 0x303   : > { %v2639_v61 = vpop.permute.xlu2 %1311 }
 0x30a   : > { %1229 = vrot.lane.b32.xlu1 %v1179_v54, %s2202_s25 }
 0x30b   : > { %v1294_v62 = vpop.permute.xlu2 %1293 }
 0x312   : > { %1183 = vrot.lane.b32.xlu1 %v1180_v8, %s2199_s22 }
 0x313   : > { %v2654_v18 = vpop.permute.xlu2 %1343 }
 0x31a   : > { %1423 = vrot.lane.b32.xlu1 %v1179_v54, %s2866_s12 }
 0x31b   : > { %v2643_v63 = vpop.permute.xlu0 %1375  ;;  %v1246_v9 = vpop.permute.xlu2 %1245 }
 0x31c   : > { %v1392_v13 = vpop.permute.xlu1 %1391 }
 0x322   : > { %1441 = vrot.lane.b32.xlu1 %v1180_v8, %s2198_s21 }
 0x323   : > { %v1296_v22 = vpop.permute.xlu0 %1295  ;;  %v2680_v5 = vpop.permute.xlu2 %1263 }
 0x324   : > { %v1297_v25 = vsel %vm572_vm1, %v1294_v62, %v1296_v22  ;;  %v1298_v26 = vsel %vm572_vm1, %v1296_v22, %v1294_v62  ;;  %v1394_v27 = vpop.permute.xlu1 %1393  ;;  %v1988_v22 = vld [vmem:[%s2850_s1 + $0x24] ss:$8 sm:$0x3]  ;;  %vm1724_vm1 = vcmask 1043456  }
 0x325   : > { %v1305_v28 = vmul.f32 %v1301_v19, %v1298_v26  ;;  %v1306_v16 = vmul.f32 %v1302_v11, %v1297_v25  ;;  %v1531_v29 = vmul.f32 %v1527_v20, %v1297_v25  ;;  %v1532_v15 = vmul.f32 %v1528_v21, %v1298_v26 }
 0x326   : > { %v1395_v31 = vsel %vm722_vm7, %v1392_v13, %v1394_v27  ;;  %v1396_v32 = vsel %vm722_vm7, %v1394_v27, %v1392_v13  ;;  %v1222_v27 = vperm.slane %v1971_v7, 1  ;;  %vm2871_vm7 = vcmp.lt.s32.totalorder %v2351_v48, 65 }
 0x327   : > { %v1307_v33 = vpack.c.bf16 %v1306_v16, %v1305_v28  ;;  %v1533_v34 = vpack.c.bf16 %v1532_v15, %v1531_v29  ;;  %v1403_v35 = vmul.f32 %v1399_v23, %v1395_v31  ;;  %v1404_v1 = vmul.f32 %v1400_v24, %v1396_v32  ;;  %v1981_v24 = vld [vmem:[%s2850_s1 + $0x14] ss:$8 sm:$0x3] }
 0x328   : > { %v1477_v28 = vperm.slane %v1988_v22, 0  ;;  %v1478_v16 = vperm.slane %v1988_v22, 1  ;;  %v1381_v31 = vperm.slane %v1981_v24, 0 }
 0x329   : > { %1308 = vst [vmem:[#allocation2 + $0x38] sm:$0xff] %v1307_v33  ;;  %v1405_v2 = vpack.c.bf16 %v1404_v1, %v1403_v35 }
 0x32a   : > { %1534 = vst [vmem:[#allocation2 + $0xc8] sm:$0xff] %v1533_v34 }
 0x32b   : > { %1406 = vst [vmem:[#allocation2 + $0x70] sm:$0xff] %v1405_v2  ;;  %v2665_v36 = vpop.permute.xlu0 %1357  ;;  %v1214_v23 = vpop.permute.xlu2 %1213  ;;  %v1382_v2 = vperm.slane %v1981_v24, 1 }
 0x32c   : > { %v1408_v37 = vpop.permute.xlu1 %1407 }
 0x332   : > { %v2053_v29 = vld [vmem:[#allocation2 + $0x70] sm:$0xf]  ;;  %v2133_v15 = vld [vmem:[#allocation2 + $0x74] sm:$0xf] }
 0x333   : > { %v1248_v43 = vpop.permute.xlu0 %1247 }
 0x334   : > { %v1249_v3 = vsel %vm500_vm15, %v1246_v9, %v1248_v43  ;;  %v1250_v45 = vsel %vm500_vm15, %v1248_v43, %v1246_v9  ;;  %v1410_v46 = vpop.permute.xlu1 %1409  ;;  %vm2878_vm15 = vmmov %vm2877_vm14 }
 0x335   : > { %v1257_v47 = vmul.f32 %v1253_v39, %v1250_v45  ;;  %v1258_v49 = vmul.f32 %v1254_v40, %v1249_v3  ;;  %v1501_v50 = vmul.f32 %v1497_v41, %v1249_v3  ;;  %v1502_v51 = vmul.f32 %v1498_v42, %v1250_v45 }
 0x336   : > { %v1411_v52 = vsel %vm745_vm8, %v1408_v37, %v1410_v46  ;;  %v1412_v53 = vsel %vm745_vm8, %v1410_v46, %v1408_v37  ;;  %vm2872_vm8 = vmmov %vm2871_vm7 }
 0x337   : > { %v1259_v54 = vpack.c.bf16 %v1258_v49, %v1257_v47  ;;  %v1503_v8 = vpack.c.bf16 %v1502_v51, %v1501_v50  ;;  %v1419_v55 = vmul.f32 %v1415_v4, %v1411_v52  ;;  %v1420_v56 = vmul.f32 %v1416_v44, %v1412_v53  ;;  %v2719_v52 = vpop.permute.xlu2 %1231 }
 0x339   : > { %1260 = vst [vmem:[#allocation2 + $0x20] sm:$0xff] %v1259_v54  ;;  %v1421_v58 = vpack.c.bf16 %v1420_v56, %v1419_v55  ;;  %v1987_v55 = vld [vmem:[%s2850_s1 + $0x23] ss:$8 sm:$0x3] }
 0x33a   : > { %1504 = vst [vmem:[#allocation2 + $0xb0] sm:$0xff] %v1503_v8 }
 0x33b   : > { %1422 = vst [vmem:[#allocation2 + $0x78] sm:$0xff] %v1421_v58  ;;  %v2692_v62 = vpop.permute.xlu0 %1325 }
 0x33c   : > { %v1310_v13 = vpop.permute.xlu1 %1309 }
 0x33d   : > { %v1313_v14 = vsel %vm598_vm2, %v1310_v13, %v2639_v61  ;;  %v1314_v17 = vsel %vm598_vm2, %v2639_v61, %v1310_v13  ;;  %v1221_v61 = vperm.slane %v1971_v7, 0  ;;  %vm2867_vm2 = vcmp.lt.s32.totalorder %v2351_v48, 63 }
 0x33e   : > { %v1321_v19 = vmul.f32 %v1317_v0, %v1314_v17  ;;  %v1322_v11 = vmul.f32 %v1318_v59, %v1313_v14  ;;  %v1541_v20 = vmul.f32 %v1537_v60, %v1313_v14  ;;  %v1542_v21 = vmul.f32 %v1538_v30, %v1314_v17  ;;  %v1992_v60 = vld [vmem:[%s2850_s1 + $0x30] ss:$8 sm:$0x3]  ;;  %v2047_v14 = vld [vmem:[#allocation2 + $0x68] sm:$0xf0] }
 0x33f   : > { %v1467_v0 = vperm.slane %v1987_v55, 0  ;;  %v1468_v59 = vperm.slane %v1987_v55, 1  ;;  %v1198_v17 = vpop.permute.xlu2 %1197  ;;  %v1517_v24 = vperm.slane %v1992_v60, 0 }
 0x340   : > { %v1323_v25 = vpack.c.bf16 %v1322_v11, %v1321_v19  ;;  %v1543_v26 = vpack.c.bf16 %v1542_v21, %v1541_v20  ;;  %v1285_v19 = vperm.slane %v1975_v10, 0  ;;  %v1286_v11 = vperm.slane %v1975_v10, 1  ;;  %v1974_v10 = vld [vmem:[%s2850_s1 + $0x5] ss:$8 sm:$0x3] }
 0x342   : > { %1324 = vst [vmem:[#allocation2 + $0x40] sm:$0xff] %v1323_v25  ;;  %v2134_v32 = vld [vmem:[#allocation2 + $0x74] sm:$0xf0]  ;;  %v2055_v33 = vld [vmem:[#allocation2 + $0x78] sm:$0xf0]  ;;  %v1664_v34 = vunpack.c.l.b16 %v1543_v26  ;;  %v1665_v35 = vunpack.c.h.b16 %v1543_v26  ;;  %v1518_v25 = vperm.slane %v1992_v60, 1 }
 0x343   : > { %v1216_v1 = vpop.permute.xlu0 %1215  ;;  %v2054_v9 = vor.u32 %v2134_v32, %v2053_v29  ;;  %v2058_v37 = vor.u32 %v2133_v15, %v2055_v33 }
 0x344   : > { %v1217_v6 = vsel %vm451_vm13, %v1214_v23, %v1216_v1  ;;  %v1218_v38 = vsel %vm451_vm13, %v1216_v1, %v1214_v23  ;;  %v1374_v12 = vpop.permute.xlu1 %1373  ;;  %v1692_v39 = vpack.c.b16 %v1664_v34, %v1664_v34  ;;  %v1693_v40 = vpack.c.b16 %v1665_v35, %v1665_v35  ;;  %v1979_v35 = vld [vmem:[%s2850_s1 + $0x12] ss:$8 sm:$0x3] }
 0x345   : > { %v1225_v41 = vmul.f32 %v1221_v61, %v1218_v38  ;;  %v1226_v42 = vmul.f32 %v1222_v27, %v1217_v6  ;;  %v1481_v43 = vmul.f32 %v1477_v28, %v1217_v6  ;;  %v1482_v4 = vmul.f32 %v1478_v16, %v1218_v38  ;;  %1731 = vmatpush.bf16.msrb.mxu0 %v2054_v9 }
 0x346   : > { %v1377_v44 = vsel %vm696_vm6, %v1374_v12, %v2643_v63  ;;  %v1378_v3 = vsel %vm696_vm6, %v2643_v63, %v1374_v12  ;;  %1757 = vmatpush.bf16.msrb.mxu1 %v2058_v37  ;;  %v1726_v45 = vsel %vm1724_vm1, %v1692_v39, 0  ;;  %v1729_v46 = vsel %vm1724_vm1, %v1693_v40, 0  ;;  %v1970_v63 = vld [vmem:[%s2850_s1 + $0x1] ss:$8 sm:$0x3] }
 0x347   : > { %v1227_v47 = vpack.c.bf16 %v1226_v42, %v1225_v41  ;;  %v1483_v49 = vpack.c.bf16 %v1482_v4, %v1481_v43  ;;  %v1385_v50 = vmul.f32 %v1381_v31, %v1378_v3  ;;  %v1386_v51 = vmul.f32 %v1382_v2, %v1377_v44  ;;  %1746 = vmatpush.bf16.msrb.mxu3 %v1726_v45  ;;  %v1980_v43 = vld [vmem:[%s2850_s1 + $0x13] ss:$8 sm:$0x3] }
 0x348   : > { %1772 = vmatpush.bf16.msrb.mxu2 %v1729_v46  ;;  %v1205_v56 = vperm.slane %v1970_v63, 0  ;;  %v1206_v58 = vperm.slane %v1970_v63, 1  ;;  %v1349_v6 = vperm.slane %v1979_v35, 0  ;;  %v1350_v38 = vperm.slane %v1979_v35, 1  ;;  %v2144_v3 = vld [vmem:[#allocation2 + $0xc4] sm:$0xf0] }
 0x349   : > { %1228 = vst [vmem:[#allocation2 + $0x10] sm:$0xff] %v1227_v47  ;;  %v1387_v53 = vpack.c.bf16 %v1386_v51, %v1385_v50  ;;  %v1365_v45 = vperm.slane %v1980_v43, 0  ;;  %v1366_v46 = vperm.slane %v1980_v43, 1  ;;  %v2095_v50 = vld [vmem:[#allocation2 + $0xc8] sm:$0xf0] }
 0x34a   : > { %1484 = vst [vmem:[#allocation2 + $0xa0] sm:$0xff] %v1483_v49  ;;  %v2085_v43 = vld [vmem:[#allocation2 + $0xb0] sm:$0xf] }
 0x34b   : > { %1388 = vst [vmem:[#allocation2 + $0x60] sm:$0xff] %v1387_v53  ;;  %v2721_v54 = vpop.permute.xlu0 %1181 }
 0x34c   : > { %v1278_v8 = vpop.permute.xlu1 %1277 }
 0x352   : > { %v2045_v30 = vld [vmem:[#allocation2 + $0x60] sm:$0xf]  ;;  %v2131_v13 = vld [vmem:[#allocation2 + $0x64] sm:$0xf] }
 0x353   : > { %v1200_v7 = vpop.permute.xlu0 %1199  ;;  %v2046_v20 = vor.u32 %v2132_v57, %v2045_v30  ;;  %v2050_v21 = vor.u32 %v2131_v13, %v2047_v14  ;;  %v1991_v57 = vld [vmem:[%s2850_s1 + $0x27] ss:$8 sm:$0x3] }
 0x354   : > { %v1201_v22 = vsel %vm425_vm12, %v1198_v17, %v1200_v7  ;;  %v1202_v23 = vsel %vm425_vm12, %v1200_v7, %v1198_v17  ;;  %v1280_v26 = vpop.permute.xlu1 %1279  ;;  %v1507_v60 = vperm.slane %v1991_v57, 0  ;;  %v1508_v30 = vperm.slane %v1991_v57, 1  ;;  %v360_v17 = vpop.f32.mrf.mxu1  ;;  %v1187_v57 = vld [vmem:[%s2850_s1] ss:$8 sm:$0x3] }
 0x355   : > { %v1209_v61 = vmul.f32 %v1205_v56, %v1202_v23  ;;  %v1210_v27 = vmul.f32 %v1206_v58, %v1201_v22  ;;  %v1471_v28 = vmul.f32 %v1467_v0, %v1201_v22  ;;  %v1472_v16 = vmul.f32 %v1468_v59, %v1202_v23  ;;  %1732 = vmatpush.bf16.msrb.mxu0 %v2046_v20 }
 0x356   : > { %v1281_v29 = vsel %vm549_vm10, %v1278_v8, %v1280_v26  ;;  %v1282_v15 = vsel %vm549_vm10, %v1280_v26, %v1278_v8  ;;  %1758 = vmatpush.bf16.msrb.mxu1 %v2050_v21  ;;  %v1269_v0 = vperm.slane %v1974_v10, 0  ;;  %v1270_v59 = vperm.slane %v1974_v10, 1  ;;  %v1978_v26 = vld [vmem:[%s2850_s1 + $0x11] ss:$8 sm:$0x3] }
 0x357   : > { %v1211_v31 = vpack.c.bf16 %v1210_v27, %v1209_v61  ;;  %v1473_v32 = vpack.c.bf16 %v1472_v16, %v1471_v28  ;;  %v1289_v33 = vmul.f32 %v1285_v19, %v1282_v15  ;;  %v1290_v34 = vmul.f32 %v1286_v11, %v1281_v29 }
 0x358   : > { %v1521_v1 = vmul.f32 %v1517_v24, %v1281_v29  ;;  %v1522_v2 = vmul.f32 %v1518_v25, %v1282_v15  ;;  %vm2873_vm10 = vcmp.lt.s32.totalorder %v2351_v48, 73  ;;  %vm2875_vm12 = vcmp.lt.s32.totalorder %v2351_v48, 120 }
 0x359   : > { %1212 = vst [vmem:[#allocation2 + $0x8] sm:$0xff] %v1211_v31  ;;  %v1291_v9 = vpack.c.bf16 %v1290_v34, %v1289_v33  ;;  %v1333_v33 = vperm.slane %v1978_v26, 0  ;;  %v1334_v34 = vperm.slane %v1978_v26, 1  ;;  %v2023_v26 = vld [vmem:[#allocation2 + $0x38] sm:$0xf0]  ;;  %vm2874_vm11 = vmmov %vm2873_vm10 }
 0x35a   : > { %1474 = vst [vmem:[#allocation2 + $0x98] sm:$0xff] %v1473_v32  ;;  %v1523_v37 = vpack.c.bf16 %v1522_v2, %v1521_v1  ;;  %vm2876_vm13 = vmmov %vm2875_vm12 }
 0x35b   : > { %1292 = vst [vmem:[#allocation2 + $0x30] sm:$0xff] %v1291_v9  ;;  %v2755_v44 = vpop.permute.xlu0 %1439 }
 0x35c   : > { %1524 = vst [vmem:[#allocation2 + $0xc0] sm:$0xff] %v1523_v37  ;;  %v1342_v12 = vpop.permute.xlu1 %1341  ;;  %v362_v9 = vpop.f32.mrf.mxu1 }
 0x35d   : > { %v1345_v39 = vsel %vm647_vm4, %v1342_v12, %v2654_v18  ;;  %v1346_v40 = vsel %vm647_vm4, %v2654_v18, %v1342_v12  ;;  %vm2868_vm4 = vmmov %vm2867_vm2  ;;  %v2123_v9 = vld [vmem:[#allocation2 + $0x24] sm:$0xf] }
 0x35e   : > { %v1353_v41 = vmul.f32 %v1349_v6, %v1346_v40  ;;  %v1354_v42 = vmul.f32 %v1350_v38, %v1345_v39  ;;  %v1972_v40 = vld [vmem:[%s2850_s1 + $0x3] ss:$8 sm:$0x3] }
 0x360   : > { %v1355_v4 = vpack.c.bf16 %v1354_v42, %v1353_v41  ;;  %v1989_v41 = vld [vmem:[%s2850_s1 + $0x25] ss:$8 sm:$0x3] }
 0x362   : > { %1356 = vst [vmem:[#allocation2 + $0x50] sm:$0xff] %v1355_v4  ;;  %v2141_v4 = vld [vmem:[#allocation2 + $0xb4] sm:$0xf] }
 0x363   : > { %v2093_v47 = vld [vmem:[#allocation2 + $0xc0] sm:$0xf]  ;;  %v2143_v49 = vld [vmem:[#allocation2 + $0xc4] sm:$0xf]  ;;  %v320_v13 = vpop.permute.xlu0 %319 }
 0x364   : > { %v2094_v51 = vor.u32 %v2144_v3, %v2093_v47  ;;  %v2098_v53 = vor.u32 %v2143_v49, %v2095_v50  ;;  %v1360_v8 = vpop.permute.xlu1 %1359  ;;  %v2771_v19 = vadd.f32 %v360_v17, %v320_v13  ;;  %v1237_v3 = vperm.slane %v1972_v40, 0 }
 0x365   : > { %v1361_v18 = vsel %vm670_vm5, %v2665_v36, %v1360_v8  ;;  %v1362_v63 = vsel %vm670_vm5, %v1360_v8, %v2665_v36  ;;  %v347_v36 = vpop.f32.mrf.mxu0  ;;  %vm2869_vm5 = vcmp.lt.s32.totalorder %v2351_v48, 9  ;;  %v1190_v17 = vperm.slane %v1187_v57, 1 }
 0x366   : > { %1747 = vmatpush.bf16.msrb.mxu3 %v2094_v51  ;;  %1773 = vmatpush.bf16.msrb.mxu2 %v2098_v53  ;;  %v1369_v55 = vmul.f32 %v1365_v45, %v1362_v63  ;;  %v1370_v56 = vmul.f32 %v1366_v46, %v1361_v18  ;;  %v2769_v14 = vadd.f32 %v347_v36, %v320_v13  ;;  %vm2870_vm6 = vmmov %vm2869_vm5  ;;  %v1238_v45 = vperm.slane %v1972_v40, 1  ;;  %v2021_v13 = vld [vmem:[#allocation2 + $0x30] sm:$0xf] }
 0x367   : > { %v369_v27 = vmul.f32 %v2771_v19, %v2771_v19  ;;  %v1487_v46 = vperm.slane %v1989_v41, 0  ;;  %v1189_v36 = vperm.slane %v1187_v57, 0 }
 0x368   : > { %v1371_v58 = vpack.c.bf16 %v1370_v56, %v1369_v55  ;;  %v368_v21 = vmul.f32 %v2769_v14, %v2769_v14  ;;  %v364_v61 = vadd.f32 %v2771_v19, %v2769_v14 }
 0x369   : > { %v2129_v15 = vld [vmem:[#allocation2 + $0x54] sm:$0xf] }
 0x36a   : > { %1372 = vst [vmem:[#allocation2 + $0x58] sm:$0xff] %v1371_v58  ;;  %365 = vadd.xlane.f32.xlu1 %v364_v61  ;;  %v370_v32 = vadd.f32 %v369_v27, %v368_v21  ;;  %v1986_v58 = vld [vmem:[%s2850_s1 + $0x22] ss:$8 sm:$0x3] }
 0x36c   : > { %v1262_v7 = vpop.permute.xlu1 %1261  ;;  %371 = vadd.xlane.f32.xlu0 %v370_v32  ;;  %v1984_v32 = vld [vmem:[%s2850_s1 + $0x20] ss:$8 sm:$0x3] }
 0x36d   : > { %v1265_v11 = vsel %vm2867_vm2, %v1262_v7, %v2680_v5  ;;  %v1266_v20 = vsel %vm2868_vm4, %v2680_v5, %v1262_v7  ;;  %v2037_v5 = vld [vmem:[#allocation2 + $0x50] sm:$0xf]  ;;  %v349_v2 = vpop.f32.mrf.mxu0  ;;  %v1432_v40 = vperm.slane %v1984_v32, 1 }
 0x36e   : > { %v1273_v22 = vmul.f32 %v1269_v0, %v1266_v20  ;;  %v1274_v23 = vmul.f32 %v1270_v59, %v1265_v11  ;;  %v1511_v24 = vmul.f32 %v1507_v60, %v1265_v11  ;;  %v1512_v25 = vmul.f32 %v1508_v30, %v1266_v20  ;;  %v2029_v60 = vld [vmem:[#allocation2 + $0x40] sm:$0xf]  ;;  %v2127_v30 = vld [vmem:[#allocation2 + $0x44] sm:$0xf] }
 0x36f   : > { %v1457_v11 = vperm.slane %v1986_v58, 0  ;;  %v1458_v20 = vperm.slane %v1986_v58, 1 }
 0x370   : > { %v1275_v28 = vpack.c.bf16 %v1274_v23, %v1273_v22  ;;  %v1513_v16 = vpack.c.bf16 %v1512_v25, %v1511_v24  ;;  %v2125_v23 = vld [vmem:[#allocation2 + $0x34] sm:$0xf]  ;;  %v2126_v25 = vld [vmem:[#allocation2 + $0x34] sm:$0xf0] }
 0x371   : > { %v2130_v29 = vld [vmem:[#allocation2 + $0x54] sm:$0xf0]  ;;  %v2039_v31 = vld [vmem:[#allocation2 + $0x58] sm:$0xf0] }
 0x372   : > { %1276 = vst [vmem:[#allocation2 + $0x28] sm:$0xff] %v1275_v28  ;;  %v2038_v35 = vor.u32 %v2130_v29, %v2037_v5  ;;  %v2042_v1 = vor.u32 %v2129_v15, %v2039_v31  ;;  %v2022_v28 = vor.u32 %v2126_v25, %v2021_v13 }
 0x373   : > { %1514 = vst [vmem:[#allocation2 + $0xb8] sm:$0xff] %v1513_v16  ;;  %v2026_v16 = vor.u32 %v2125_v23, %v2023_v26 }
 0x374   : > { %v1328_v37 = vpop.permute.xlu1 %1327  ;;  %1733 = vmatpush.bf16.msrb.mxu0 %v2038_v35  ;;  %1759 = vmatpush.bf16.msrb.mxu1 %v2042_v1  ;;  %v1573_v35 = vld [vmem:[%s2854_s5] sm:$0xff] }
 0x375   : > { %v1329_v6 = vsel %vm2869_vm5, %v2692_v62, %v1328_v37  ;;  %v1330_v38 = vsel %vm2870_vm6, %v1328_v37, %v2692_v62  ;;  %v1488_v62 = vperm.slane %v1989_v41, 1  ;;  %v2077_v37 = vld [vmem:[#allocation2 + $0xa0] sm:$0xf]  ;;  %1576 = vperm.xlu2 %2172, %v1573_v35  }
 0x376   : > { %v1337_v12 = vmul.f32 %v1333_v33, %v1330_v38  ;;  %v1338_v39 = vmul.f32 %v1334_v34, %v1329_v6  ;;  %v2139_v6 = vld [vmem:[#allocation2 + $0xa4] sm:$0xf]  ;;  %v1431_v38 = vperm.slane %v1984_v32, 0 }
 0x378   : > { %v1339_v42 = vpack.c.bf16 %v1338_v39, %v1337_v12 }
 0x379   : > { %v2124_v33 = vld [vmem:[#allocation2 + $0x24] sm:$0xf0]  ;;  %v2015_v34 = vld [vmem:[#allocation2 + $0x28] sm:$0xf0] }
 0x37a   : > { %1340 = vst [vmem:[#allocation2 + $0x48] sm:$0xff] %v1339_v42  ;;  %v2142_v47 = vld [vmem:[#allocation2 + $0xb4] sm:$0xf0]  ;;  %v2087_v49 = vld [vmem:[#allocation2 + $0xb8] sm:$0xf0]  ;;  %v2018_v42 = vor.u32 %v2123_v9, %v2015_v34 }
 0x37b   : > { %v2086_v50 = vor.u32 %v2142_v47, %v2085_v43  ;;  %v2090_v51 = vor.u32 %v2141_v4, %v2087_v49  ;;  %v1545_v49 = vld [vmem:[%s2853_s4] sm:$0xff] }
 0x37c   : > { %v1230_v53 = vpop.permute.xlu1 %1229  ;;  %v1580_v57 = vunpack.c.l.b16 %v1545_v49 }
 0x37d   : > { %1748 = vmatpush.bf16.msrb.mxu3 %v2086_v50  ;;  %1774 = vmatpush.bf16.msrb.mxu2 %v2090_v51  ;;  %v1233_v8 = vsel %vm2871_vm7, %v1230_v53, %v2719_v52  ;;  %v1234_v18 = vsel %vm2872_vm8, %v2719_v52, %v1230_v53  ;;  %v2005_v51 = vld [vmem:[#allocation2 + $0x10] sm:$0xf]  ;;  %v2121_v53 = vld [vmem:[#allocation2 + $0x14] sm:$0xf] }
 0x37e   : > { %v1241_v63 = vmul.f32 %v1237_v3, %v1234_v18  ;;  %v1242_v55 = vmul.f32 %v1238_v45, %v1233_v8  ;;  %v1491_v56 = vmul.f32 %v1487_v46, %v1233_v8  ;;  %v1492_v10 = vmul.f32 %v1488_v62, %v1234_v18  ;;  %v1426_v46 = vpop.permute.xlu2 %1425 }
 0x37f   : > { %v1582_v23 = vpack.c.b16 %v1580_v57, %v1580_v57 }
 0x380   : > { %v1243_v0 = vpack.c.bf16 %v1242_v55, %v1241_v63  ;;  %v1493_v59 = vpack.c.bf16 %v1492_v10, %v1491_v56  ;;  %v1985_v56 = vld [vmem:[%s2850_s1 + $0x21] ss:$8 sm:$0x3]  ;;  %v2120_v10 = vld [vmem:[#allocation2 + $0x4] sm:$0xf0] }
 0x381   : > { %v2128_v52 = vld [vmem:[#allocation2 + $0x44] sm:$0xf0]  ;;  %v2031_v7 = vld [vmem:[#allocation2 + $0x48] sm:$0xf0] }
 0x382   : > { %1244 = vst [vmem:[#allocation2 + $0x18] sm:$0xff] %v1243_v0  ;;  %v2030_v21 = vor.u32 %v2128_v52, %v2029_v60  ;;  %v2034_v22 = vor.u32 %v2127_v30, %v2031_v7  ;;  %v2138_v0 = vld [vmem:[#allocation2 + $0x94] sm:$0xf0]  ;;  %v1999_v60 = vld [vmem:[#allocation2 + $0x8] sm:$0xf0]  ;;  %v1447_v30 = vperm.slane %v1985_v56, 0 }
 0x383   : > { %1494 = vst [vmem:[#allocation2 + $0xa8] sm:$0xff] %v1493_v59  ;;  %v2071_v59 = vld [vmem:[#allocation2 + $0x98] sm:$0xf0]  ;;  %v1448_v7 = vperm.slane %v1985_v56, 1 }
 0x384   : > { %v1184_v24 = vpop.permute.xlu1 %1183  ;;  %1734 = vmatpush.bf16.msrb.mxu0 %v2030_v21  ;;  %1760 = vmatpush.bf16.msrb.mxu1 %v2034_v22 }
 0x385   : > { %v1185_v61 = vsel %vm2873_vm10, %v2721_v54, %v1184_v24  ;;  %v1186_v27 = vsel %vm2874_vm11, %v1184_v24, %v2721_v54  ;;  %v2013_v54 = vld [vmem:[#allocation2 + $0x20] sm:$0xf] }
 0x386   : > { %v1193_v5 = vmul.f32 %v1189_v36, %v1186_v27  ;;  %v1194_v29 = vmul.f32 %v1190_v17, %v1185_v61  ;;  %v1461_v15 = vmul.f32 %v1457_v11, %v1185_v61  ;;  %v1462_v31 = vmul.f32 %v1458_v20, %v1186_v27 }
 0x387   : > { %v2014_v41 = vor.u32 %v2124_v33, %v2013_v54 }
 0x388   : > { %v1195_v1 = vpack.c.bf16 %v1194_v29, %v1193_v5  ;;  %v1463_v2 = vpack.c.bf16 %v1462_v31, %v1461_v15  ;;  %1735 = vmatpush.bf16.msrb.mxu0 %v2022_v28  ;;  %1761 = vmatpush.bf16.msrb.mxu1 %v2026_v16  ;;  %v1581_v16 = vunpack.c.h.b16 %v1545_v49 }
 0x389   : > { %v2122_v3 = vld [vmem:[#allocation2 + $0x14] sm:$0xf0]  ;;  %v2007_v45 = vld [vmem:[#allocation2 + $0x18] sm:$0xf0] }
 0x38a   : > { %1196 = vst [vmem:[#allocation2] sm:$0xff] %v1195_v1  ;;  %v2140_v12 = vld [vmem:[#allocation2 + $0xa4] sm:$0xf0]  ;;  %v2079_v39 = vld [vmem:[#allocation2 + $0xa8] sm:$0xf0]  ;;  %v2006_v63 = vor.u32 %v2122_v3, %v2005_v51  ;;  %v2010_v55 = vor.u32 %v2121_v53, %v2007_v45  ;;  %v1583_v34 = vpack.c.b16 %v1581_v16, %v1581_v16 }
 0x38b   : > { %1464 = vst [vmem:[#allocation2 + $0x90] sm:$0xff] %v1463_v2  ;;  %v2078_v43 = vor.u32 %v2140_v12, %v2077_v37  ;;  %v2082_v4 = vor.u32 %v2139_v6, %v2079_v39 }
 0x38c   : > { %v1424_v47 = vpop.permute.xlu1 %1423  ;;  %1736 = vmatpush.bf16.msrb.mxu0 %v2014_v41  ;;  %1762 = vmatpush.bf16.msrb.mxu1 %v2018_v42 }
 0x38d   : > { %1749 = vmatpush.bf16.msrb.mxu3 %v2078_v43  ;;  %1775 = vmatpush.bf16.msrb.mxu2 %v2082_v4  ;;  %v1427_v62 = vsel %vm2875_vm12, %v1424_v47, %v1426_v46  ;;  %v1428_v50 = vsel %vm2876_vm13, %v1426_v46, %v1424_v47 }
 0x38e   : > { %v1435_v8 = vmul.f32 %v1431_v38, %v1427_v62  ;;  %v1436_v18 = vmul.f32 %v1432_v40, %v1428_v50 }
 0x390   : > { %v1437_v58 = vpack.c.bf16 %v1436_v18, %v1435_v8  ;;  %1737 = vmatpush.bf16.msrb.mxu0 %v2006_v63  ;;  %1763 = vmatpush.bf16.msrb.mxu1 %v2010_v55 }
 0x391   : > { %v1997_v13 = vld [vmem:[#allocation2] sm:$0xf]  ;;  %v2119_v36 = vld [vmem:[#allocation2 + $0x4] sm:$0xf] }
 0x392   : > { %1438 = vst [vmem:[#allocation2 + $0x80] sm:$0xff] %v1437_v58  ;;  %v2069_v17 = vld [vmem:[#allocation2 + $0x90] sm:$0xf]  ;;  %v2137_v52 = vld [vmem:[#allocation2 + $0x94] sm:$0xf]  ;;  %v1998_v11 = vor.u32 %v2120_v10, %v1997_v13  ;;  %v2002_v20 = vor.u32 %v2119_v36, %v1999_v60 }
 0x393   : > { %v2070_v21 = vor.u32 %v2138_v0, %v2069_v17  ;;  %v2074_v22 = vor.u32 %v2137_v52, %v2071_v59 }
 0x394   : > { %v1442_v24 = vpop.permute.xlu1 %1441  ;;  %1738 = vmatpush.bf16.msrb.mxu0 %v1998_v11  ;;  %1764 = vmatpush.bf16.msrb.mxu1 %v2002_v20 }
 0x395   : > { %1750 = vmatpush.bf16.msrb.mxu3 %v2070_v21  ;;  %1776 = vmatpush.bf16.msrb.mxu2 %v2074_v22  ;;  %v1443_v25 = vsel %vm2877_vm14, %v2755_v44, %v1442_v24  ;;  %v1444_v26 = vsel %vm2878_vm15, %v1442_v24, %v2755_v44 }
 0x396   : > { %v1451_v61 = vmul.f32 %v1447_v30, %v1443_v25  ;;  %v1452_v27 = vmul.f32 %v1448_v7, %v1444_v26 }
 0x397   : > { %1739 = vmatmul.bf16.vlgmr.msrb.gmra.mxu0 %v1582_v23  ;;  %1765 = vmatmul.bf16.vlgmr.msrb.gmra.mxu1 %v1582_v23 }
 0x398   : > { %v1453_v28 = vpack.c.bf16 %v1452_v27, %v1451_v61 }
 0x399   : > { %v2061_v5 = vld [vmem:[#allocation2 + $0x80] sm:$0xf]  ;;  %v2135_v15 = vld [vmem:[#allocation2 + $0x84] sm:$0xf] }
 0x39a   : > { %1454 = vst [vmem:[#allocation2 + $0x88] sm:$0xff] %v1453_v28 }
 0x3a1   : > { %v2136_v29 = vld [vmem:[#allocation2 + $0x84] sm:$0xf0]  ;;  %v2063_v31 = vld [vmem:[#allocation2 + $0x88] sm:$0xf0] }
 0x3a2   : > { %v2062_v32 = vor.u32 %v2136_v29, %v2061_v5  ;;  %v2066_v33 = vor.u32 %v2135_v15, %v2063_v31 }
 0x3a4   : > { %1751 = vmatpush.bf16.msrb.mxu3 %v2062_v32  ;;  %1777 = vmatpush.bf16.msrb.mxu2 %v2066_v33 }
 0x3a7   : > { %2099 = vmatmul.msk.bf16.vlgmr.msrb.gmra.mxu3 %vm1720_vm9, %v1583_v34  ;;  %2100 = vmatmul.msk.bf16.vlgmr.msrb.gmra.mxu2 %vm1720_vm9, %v1583_v34 }
 0x3cf   : > { %v1577_v2 = vpop.permute.xlu2 %1576 }
 0x3dd   : > { %v366_v3 = vpop.xlane.xlu1 %365 }
 0x3de   : > { %v367_v45 = vmul.f32 0.00390625, %v366_v3 }
 0x3df   : > { %v372_v46 = vpop.xlane.xlu0 %371 }
 0x3e0   : > { %v373_v47 = vmul.f32 0.00390625, %v372_v46  ;;  %v374_v49 = vmul.f32 %v367_v45, %v367_v45  ;;  %v377_v20 = vsub.f32 %v2769_v14, %v367_v45  ;;  %v378_v21 = vsub.f32 %v2771_v19, %v367_v45 }
 0x3e2   : > { %v375_v62 = vsub.f32 %v373_v47, %v374_v49 }
 0x3e4   : > { %v376_v50 = vmax.f32 %v375_v62, 0.0 }
 0x3e6   : > { %v379_v51 = vadd.f32 1e-05, %v376_v50 }
 0x3e8   : > { %2176 = vrsqrt.f32 %v379_v51  ;;  %vm386_vm0 = vweird.f32 %v379_v51 }
 0x3ee   : > { %v2177_v63 = vpop.eup %2176 }
 0x3ef   : > { %v381_v57 = vmul.f32 %v2177_v63, %v379_v51  ;;  %vm387_vm3 = vweird.f32 %v2177_v63 }
 0x3f0   : > { %vm388_vm1 = vmor %vm386_vm0, %vm387_vm3 }
 0x3f1   : > { %v382_v59 = vmul.f32 %v2177_v63, %v381_v57 }
 0x3f3   : > { %v383_v60 = vmul.f32 0.5, %v382_v59 }
 0x3f5   : > { %v384_v13 = vsub.f32 1.5, %v383_v60 }
 0x3f7   : > { %v385_v52 = vmul.f32 %v2177_v63, %v384_v13 }
 0x3f9   : > { %v389_v22 = vsel %vm388_vm1, %v2177_v63, %v385_v52 }
 0x3fa   : > { %v390_v61 = vmul.f32 %v389_v22, %v377_v20  ;;  %v391_v27 = vmul.f32 %v389_v22, %v378_v21 }
 0x414   : > { %v1740_v48 = vpop.f32.mrf.mxu0  ;;  %v1766_v44 = vpop.f32.mrf.mxu1 }
 0x415   : > { %v1741_v54 = vadd.f32 %v1740_v48, %v1577_v2  ;;  %v1767_v9 = vadd.f32 %v1766_v44, %v1577_v2 }
 0x41c   : > { %v1742_v35 = vpop.f32.mrf.mxu0  ;;  %v1768_v1 = vpop.f32.mrf.mxu1 }
 0x42a   : > { %v1753_v37 = vpop.f32.mrf.mxu3  ;;  %v1779_v6 = vpop.f32.mrf.mxu2 }
 0x42b   : > { %v1754_v38 = vadd.f32 %v1753_v37, %v1741_v54  ;;  %v1780_v12 = vadd.f32 %v1779_v6, %v1767_v9 }
 0x42d   : > { %v1783_v39 = vadd.f32 %v1780_v12, %v1754_v38  ;;  %v1787_v40 = vmul.f32 %v1754_v38, %v1754_v38  ;;  %v1788_v41 = vmul.f32 %v1780_v12, %v1780_v12 }
 0x42f   : > { %1784 = vadd.xlane.f32.xlu2 %v1783_v39  ;;  %v1789_v42 = vadd.f32 %v1788_v41, %v1787_v40 }
 0x431   : > { %1790 = vadd.xlane.f32.xlu1 %v1789_v42 }
 0x432   : > { %v1755_v43 = vpop.f32.mrf.mxu3  ;;  %v1781_v4 = vpop.f32.mrf.mxu2 }
 0x4a2   : > { %v1785_v53 = vpop.xlane.xlu2 %1784 }
 0x4a3   : > { %v1786_v8 = vmul.f32 0.00390625, %v1785_v53 }
 0x4a4   : > { %v1791_v18 = vpop.xlane.xlu1 %1790 }
 0x4a5   : > { %v1793_v55 = vmul.f32 %v1786_v8, %v1786_v8  ;;  %v1792_v56 = vmul.f32 0.00390625, %v1791_v18  ;;  %v1796_v24 = vsub.f32 %v1754_v38, %v1786_v8  ;;  %v1797_v25 = vsub.f32 %v1780_v12, %v1786_v8 }
 0x4a7   : > { %v1794_v10 = vsub.f32 %v1792_v56, %v1793_v55 }
 0x4a9   : > { %v1795_v58 = vmax.f32 %v1794_v10, 0.0 }
 0x4ab   : > { %v1798_v0 = vadd.f32 1e-05, %v1795_v58 }
 0x4ad   : > { %2178 = vrsqrt.f32 %v1798_v0  ;;  %vm1805_vm4 = vweird.f32 %v1798_v0 }
 0x4b3   : > { %v2179_v30 = vpop.eup %2178 }
 0x4b4   : > { %v1800_v36 = vmul.f32 %v2179_v30, %v1798_v0  ;;  %vm1806_vm2 = vweird.f32 %v2179_v30 }
 0x4b5   : > { %vm1807_vm5 = vmor %vm1805_vm4, %vm1806_vm2 }
 0x4b6   : > { %v1801_v17 = vmul.f32 %v2179_v30, %v1800_v36 }
 0x4b8   : > { %v1802_v7 = vmul.f32 0.5, %v1801_v17 }
 0x4ba   : > { %v1803_v11 = vsub.f32 1.5, %v1802_v7 }
 0x4bc   : > { %v1804_v23 = vmul.f32 %v2179_v30, %v1803_v11 }
 0x4be   : > { %v1808_v26 = vsel %vm1807_vm5, %v2179_v30, %v1804_v23 }
 0x4bf   : > { %v1809_v28 = vmul.f32 %v1808_v26, %v1796_v24  ;;  %v1810_v16 = vmul.f32 %v1808_v26, %v1797_v25 }
 0x4c1   : > { %v1811_v5 = vadd.f32 %v1809_v28, %v390_v61  ;;  %v1812_v29 = vadd.f32 %v1810_v16, %v391_v27 }
 0x4c3   : > { %vm1813_vm6 = vcmp.gt.f32.partialorder %v1811_v5, 0.0  ;;  %vm1814_vm7 = vcmp.gt.f32.partialorder %v1812_v29, 0.0  ;;  %v1815_v14 = vmul.f32 0.01, %v1811_v5  ;;  %v1816_v19 = vmul.f32 0.01, %v1812_v29 }
 0x4c5   : > { %v1817_v15 = vsel %vm1813_vm6, %v1811_v5, %v1815_v14  ;;  %v1818_v31 = vsel %vm1814_vm7, %v1812_v29, %v1816_v19 }
 0x4c6   : > { %1819 = vst [vmem:[%s305_s19] sm:$0xff] %v1817_v15 }
 0x4c7   : > { %1820 = vst [vmem:[%s305_s19 + $0x8] sm:$0xff] %v1818_v31 }
 0x4c8 PF: > { %s18_s27 = sadd.s32 1, %s2186_s27  }
 0x4c9   : > { %p15_p4 = scmp.ge.s32.totalorder %s18_s27, 4  }
 0x4cb   :  { %17 = sbr.rel (!%p15_p4) target bundleno = 1 (0x1), region = 107 }

</bundles_post_ra>
